<compile_context>
chip_gen: v7x
topology: tpu7x:2x2x1
jax: 0.10.0
libtpu: 0.0.40
codegen_flags: <defaults>
</compile_context>

<pallas_src>
import functools
import math

import jax
import jax.numpy as jnp
from jax import lax
from jax.experimental import pallas as pl
from jax.experimental.pallas import tpu as pltpu

LN_EPS = 1e-12                   # HF BERT LayerNorm eps


def _vmem_limit_bytes():
    """Generation-dependent scoped-VMEM budget (96 MiB v5e/v6e, 48 MiB v7x)."""
    try:
        cap = int(pltpu.get_tpu_info().vmem_capacity_bytes)
    except Exception:
        cap = 64 * 1024 * 1024
    return min((cap * 3) // 4, 96 * 1024 * 1024)


_VMEM_LIMIT = _vmem_limit_bytes()


def _tile(dim, target, quantum):
    """Largest tile <= target that evenly divides `dim` and is a multiple of `quantum`.
    Falls back to the full dim (always a legal block)."""
    if dim <= target:
        return dim
    t = (target // quantum) * quantum
    while t >= quantum:
        if dim % t == 0:
            return t
        t -= quantum
    return dim


# ----------------------- dense: y = x @ w + b (opt. GELU) -----------------------

def _dense_kernel(x_ref, w_ref, b_ref, o_ref, *acc, activation, nk):
    def epilogue(y):
        y = y + b_ref[...].astype(jnp.float32)
        if activation == "gelu":
            # TODO(synk): HF BERT default is exact erf-GELU; tanh approximation used here.
            c = math.sqrt(2.0 / math.pi)
            y = 0.5 * y * (1.0 + jnp.tanh(c * (y + 0.044715 * y * y * y)))
        o_ref[...] = y.astype(o_ref.dtype)

    if nk == 1:
        # full-K tile: no reduction loop, no accumulator round-trip
        epilogue(jnp.dot(x_ref[...], w_ref[...], preferred_element_type=jnp.float32))
    else:
        (acc_ref,) = acc
        k = pl.program_id(2)

        @pl.when(k == 0)
        def _():
            acc_ref[...] = jnp.zeros_like(acc_ref)

        acc_ref[...] += jnp.dot(x_ref[...], w_ref[...],
                                preferred_element_type=jnp.float32)

        @pl.when(k == nk - 1)
        def _():
            epilogue(acc_ref[...])


def dense(x, w, b, activation=None, out_dtype=jnp.bfloat16):
    M, K = x.shape
    N = w.shape[1]
    tm = _tile(M, 1024, 16)
    tn = _tile(N, 1024, 128)
    tk = _tile(K, 1536, 128)
    nk = K // tk
    grid = (M // tm, N // tn, nk)
    scratch = [] if nk == 1 else [pltpu.VMEM((tm, tn), jnp.float32)]
    return pl.pallas_call(
        functools.partial(_dense_kernel, activation=activation, nk=nk),
        out_shape=jax.ShapeDtypeStruct((M, N), out_dtype),
        grid_spec=pltpu.PrefetchScalarGridSpec(
            num_scalar_prefetch=0,
            grid=grid,
            in_specs=[
                pl.BlockSpec((tm, tk), lambda i, j, k: (i, k)),
                pl.BlockSpec((tk, tn), lambda i, j, k: (k, j)),
                pl.BlockSpec((1, tn), lambda i, j, k: (0, j)),
            ],
            out_specs=pl.BlockSpec((tm, tn), lambda i, j, k: (i, j)),
            scratch_shapes=scratch,
        ),
        compiler_params=pltpu.CompilerParams(
            dimension_semantics=("parallel", "parallel", "arbitrary"),
            vmem_limit_bytes=_VMEM_LIMIT,
        ),
    )(x.astype(jnp.bfloat16), w.astype(jnp.bfloat16),
      b.astype(jnp.float32).reshape(1, N))


# ---------------- dense + bias + residual + LayerNorm (fused epilogue) ----------------

def _dense_res_ln_kernel(x_ref, w_ref, b_ref, res_ref, g_ref, beta_ref, o_ref, *acc, nk):
    def epilogue(y):
        y = (y + b_ref[...].astype(jnp.float32)
             + res_ref[...].astype(jnp.float32))
        mean = jnp.mean(y, axis=-1, keepdims=True)
        var = jnp.mean(jnp.square(y - mean), axis=-1, keepdims=True)
        yn = (y - mean) * lax.rsqrt(var + LN_EPS)
        o_ref[...] = (yn * g_ref[...].astype(jnp.float32)
                      + beta_ref[...].astype(jnp.float32)).astype(o_ref.dtype)

    if nk == 1:
        epilogue(jnp.dot(x_ref[...], w_ref[...], preferred_element_type=jnp.float32))
    else:
        (acc_ref,) = acc
        k = pl.program_id(1)

        @pl.when(k == 0)
        def _():
            acc_ref[...] = jnp.zeros_like(acc_ref)

        acc_ref[...] += jnp.dot(x_ref[...], w_ref[...],
                                preferred_element_type=jnp.float32)

        @pl.when(k == nk - 1)
        def _():
            epilogue(acc_ref[...])


def dense_res_ln(x, w, b, residual, gamma, beta, out_dtype=jnp.bfloat16):
    M, K = x.shape
    N = w.shape[1]              # N == hidden; kept un-tiled so LN sees full rows
    tm = _tile(M, 1024, 16)
    tk = _tile(K, 1536, 128)
    nk = K // tk
    grid = (M // tm, nk)
    scratch = [] if nk == 1 else [pltpu.VMEM((tm, N), jnp.float32)]
    return pl.pallas_call(
        functools.partial(_dense_res_ln_kernel, nk=nk),
        out_shape=jax.ShapeDtypeStruct((M, N), out_dtype),
        grid_spec=pltpu.PrefetchScalarGridSpec(
            num_scalar_prefetch=0,
            grid=grid,
            in_specs=[
                pl.BlockSpec((tm, tk), lambda i, k: (i, k)),
                pl.BlockSpec((tk, N), lambda i, k: (k, 0)),
                pl.BlockSpec((1, N), lambda i, k: (0, 0)),
                pl.BlockSpec((tm, N), lambda i, k: (i, 0)),
                pl.BlockSpec((1, N), lambda i, k: (0, 0)),
                pl.BlockSpec((1, N), lambda i, k: (0, 0)),
            ],
            out_specs=pl.BlockSpec((tm, N), lambda i, k: (i, 0)),
            scratch_shapes=scratch,
        ),
        compiler_params=pltpu.CompilerParams(
            dimension_semantics=("parallel", "arbitrary"),
            vmem_limit_bytes=_VMEM_LIMIT,
        ),
    )(x.astype(jnp.bfloat16), w.astype(jnp.bfloat16),
      b.astype(jnp.float32).reshape(1, N),
      residual.astype(jnp.bfloat16),
      gamma.astype(jnp.float32).reshape(1, N),
      beta.astype(jnp.float32).reshape(1, N))


# -------------------------- standalone LayerNorm (embeddings) --------------------------

def _ln_kernel(x_ref, g_ref, b_ref, o_ref):
    x = x_ref[...].astype(jnp.float32)
    mean = jnp.mean(x, axis=-1, keepdims=True)
    var = jnp.mean(jnp.square(x - mean), axis=-1, keepdims=True)
    xn = (x - mean) * lax.rsqrt(var + LN_EPS)
    o_ref[...] = (xn * g_ref[...] + b_ref[...]).astype(o_ref.dtype)


def layernorm(x, gamma, beta, out_dtype=jnp.bfloat16):
    M, H = x.shape
    tm = _tile(M, 1024, 16)
    return pl.pallas_call(
        _ln_kernel,
        out_shape=jax.ShapeDtypeStruct((M, H), out_dtype),
        grid_spec=pltpu.PrefetchScalarGridSpec(
            num_scalar_prefetch=0,
            grid=(M // tm,),
            in_specs=[
                pl.BlockSpec((tm, H), lambda i: (i, 0)),
                pl.BlockSpec((1, H), lambda i: (0, 0)),
                pl.BlockSpec((1, H), lambda i: (0, 0)),
            ],
            out_specs=pl.BlockSpec((tm, H), lambda i: (i, 0)),
        ),
        compiler_params=pltpu.CompilerParams(
            dimension_semantics=("parallel",),
            vmem_limit_bytes=_VMEM_LIMIT,
        ),
    )(x.astype(jnp.bfloat16),   # bf16 input: this kernel is HBM-bound, halves its read
      gamma.astype(jnp.float32).reshape(1, H),
      beta.astype(jnp.float32).reshape(1, H))


# ------------------------------ flash-style attention ------------------------------
# Reads Q/K/V straight out of the [B, S, 3H] fused-QKV activation (no head transposes),
# loops over heads in-kernel, and writes a lane-dense [B, S, H] context block.
# The 1/sqrt(Dh) scale is pre-folded into the Q projection weights.

def _flash_attn_compute(q, k, v, mb_ref, o_ref, m_sc, l_sc, acc_sc, num_heads, head_dim):
    ki = pl.program_id(2)
    tq = acc_sc.shape[0]

    @pl.when(ki == 0)
    def _():
        m_sc[...] = jnp.full_like(m_sc, -1e30)
        l_sc[...] = jnp.zeros_like(l_sc)
        acc_sc[...] = jnp.zeros_like(acc_sc)

    mb = mb_ref[0]                       # [1, tkv] additive (1-mask)*-1e4 bias

    for h in range(num_heads):
        lo, hi = h * head_dim, (h + 1) * head_dim
        qh, kh, vh = q[:, lo:hi], k[:, lo:hi], v[:, lo:hi]
        # scores in f32; contraction over Dh without an explicit transpose
        s = lax.dot_general(qh, kh, (((1,), (1,)), ((), ())),
                            preferred_element_type=jnp.float32)        # [tq, tkv]
        s = s + mb                       # scale already folded into Q weights
        m_prev = m_sc[:, lo:lo + 1]
        l_prev = l_sc[:, lo:lo + 1]
        m_new = jnp.maximum(m_prev, jnp.max(s, axis=-1, keepdims=True))
        alpha = jnp.exp(m_prev - m_new)
        p = jnp.exp(s - m_new)
        l_new = alpha * l_prev + jnp.sum(p, axis=-1, keepdims=True)
        # TODO(synk): per-head PV matmul is only head_dim (e.g. 64) wide on the MXU;
        # batching >=2 heads' V columns needs a block-diagonal P and is not done here.
        pv = jnp.dot(p.astype(vh.dtype), vh, preferred_element_type=jnp.float32)
        acc_sc[:, lo:hi] = alpha * acc_sc[:, lo:hi] + pv
        m_sc[:, lo:hi] = jnp.broadcast_to(m_new, (tq, head_dim))
        l_sc[:, lo:hi] = jnp.broadcast_to(l_new, (tq, head_dim))

    @pl.when(ki == pl.num_programs(2) - 1)
    def _():
        # exact division (runs once per q-block; avoids approx-reciprocal error)
        o_ref[0] = (acc_sc[...] / l_sc[...]).astype(o_ref.dtype)


def _flash_attn_kernel_split(q_ref, k_ref, v_ref, mb_ref, o_ref, m_sc, l_sc, acc_sc,
                             *, num_heads, head_dim):
    # H % 128 == 0: Q/K/V arrive as separate lane-blocked H-wide views of the QKV tensor
    _flash_attn_compute(q_ref[0], k_ref[0], v_ref[0], mb_ref, o_ref,
                        m_sc, l_sc, acc_sc, num_heads, head_dim)


def _flash_attn_kernel_packed(q_ref, kv_ref, mb_ref, o_ref, m_sc, l_sc, acc_sc,
                              *, num_heads, head_dim):
    # small-H fallback: full 3H blocks, slice Q/K/V columns in-kernel
    H = num_heads * head_dim
    _flash_attn_compute(q_ref[0, :, 0:H],
                        kv_ref[0, :, H:2 * H],
                        kv_ref[0, :, 2 * H:3 * H],
                        mb_ref, o_ref, m_sc, l_sc, acc_sc, num_heads, head_dim)


def flash_attention(qkv, mask_bias, num_heads, out_dtype=jnp.bfloat16):
    """qkv: [B, S, 3H] bf16 (Q|K|V concatenated); mask_bias: [B, 1, S] f32 additive bias."""
    B, S, threeH = qkv.shape
    H = threeH // 3
    Dh = H // num_heads
    tq = _tile(S, 256, 16)
    tkv = _tile(S, 512, 128)
    grid = (B, S // tq, S // tkv)
    packed = (H % 128) != 0

    if packed:
        kernel = functools.partial(_flash_attn_kernel_packed,
                                   num_heads=num_heads, head_dim=Dh)
        in_specs = [
            pl.BlockSpec((1, tq, threeH), lambda b, qi, ki: (b, qi, 0)),
            pl.BlockSpec((1, tkv, threeH), lambda b, qi, ki: (b, ki, 0)),
            pl.BlockSpec((1, 1, tkv), lambda b, qi, ki: (b, 0, ki)),
        ]
        args = (qkv, qkv, mask_bias)
    else:
        kernel = functools.partial(_flash_attn_kernel_split,
                                   num_heads=num_heads, head_dim=Dh)
        in_specs = [
            pl.BlockSpec((1, tq, H), lambda b, qi, ki: (b, qi, 0)),   # Q columns
            pl.BlockSpec((1, tkv, H), lambda b, qi, ki: (b, ki, 1)),  # K columns
            pl.BlockSpec((1, tkv, H), lambda b, qi, ki: (b, ki, 2)),  # V columns
            pl.BlockSpec((1, 1, tkv), lambda b, qi, ki: (b, 0, ki)),
        ]
        args = (qkv, qkv, qkv, mask_bias)

    return pl.pallas_call(
        kernel,
        out_shape=jax.ShapeDtypeStruct((B, S, H), out_dtype),
        grid_spec=pltpu.PrefetchScalarGridSpec(
            num_scalar_prefetch=0,
            grid=grid,
            in_specs=in_specs,
            out_specs=pl.BlockSpec((1, tq, H), lambda b, qi, ki: (b, qi, 0)),
            scratch_shapes=[
                pltpu.VMEM((tq, H), jnp.float32),   # running max (per-head cols duplicated)
                pltpu.VMEM((tq, H), jnp.float32),   # running sum (per-head cols duplicated)
                pltpu.VMEM((tq, H), jnp.float32),   # output accumulator
            ],
        ),
        compiler_params=pltpu.CompilerParams(
            dimension_semantics=("parallel", "parallel", "arbitrary"),
            vmem_limit_bytes=_VMEM_LIMIT,
        ),
    )(*args)


# ------------------------------- parameters (synthetic) -------------------------------

def init_params(key, cfg):
    H, I, V, P, L = (cfg["hidden"], cfg["intermediate"], cfg["vocab"],
                     cfg["max_pos"], cfg["layers"])
    nH = cfg["heads"]
    attn_scale = 1.0 / math.sqrt(H // nH)

    def nrm(k, shape, dtype=jnp.float32):
        return (0.02 * jax.random.normal(k, shape, jnp.float32)).astype(dtype)

    keys = jax.random.split(key, 8 + L)
    params = {
        "word_emb": nrm(keys[0], (V, H)),
        "pos_emb": nrm(keys[1], (P, H)),
        "type_emb": nrm(keys[2], (2, H)),
        "emb_ln_g": jnp.ones((H,), jnp.float32),
        "emb_ln_b": jnp.zeros((H,), jnp.float32),
        "pool_w": nrm(keys[3], (H, H)),
        "pool_b": jnp.zeros((H,), jnp.float32),
        "layers": [],
    }
    for li in range(L):
        lk = jax.random.split(keys[8 + li], 8)
        # fused q|k|v weights; the attention softmax scale 1/sqrt(Dh) is folded into the
        # Q projection weight (would also be folded into the Q bias if it were nonzero).
        q_w = nrm(lk[0], (H, H)) * attn_scale
        qkv_w = jnp.concatenate([q_w, nrm(lk[1], (H, H)), nrm(lk[2], (H, H))], axis=1)
        params["layers"].append({
            "qkv_w": qkv_w.astype(jnp.bfloat16),
            "qkv_b": jnp.zeros((3 * H,), jnp.float32),
            "o_w": nrm(lk[3], (H, H), jnp.bfloat16),
            "o_b": jnp.zeros((H,), jnp.float32),
            "ln1_g": jnp.ones((H,), jnp.float32),
            "ln1_b": jnp.zeros((H,), jnp.float32),
            "i_w": nrm(lk[4], (H, I), jnp.bfloat16),
            "i_b": jnp.zeros((I,), jnp.float32),
            "f_w": nrm(lk[5], (I, H), jnp.bfloat16),
            "f_b": jnp.zeros((H,), jnp.float32),
            "ln2_g": jnp.ones((H,), jnp.float32),
            "ln2_b": jnp.zeros((H,), jnp.float32),
        })
    return params


# --------------------------------- forward pass ---------------------------------

def code_sim_sbert_forward(params, input_ids, token_type_ids, attention_mask, cfg):
    """Equivalent of CodeSimSBertTripletCLS.forward(inputs) with cls_pooling_strat."""
    B, S = input_ids.shape
    H, nH = cfg["hidden"], cfg["heads"]
    M = B * S

    # embeddings (gathers are XLA glue; normalization in a Pallas kernel)
    x = (jnp.take(params["word_emb"], input_ids, axis=0)
         + params["pos_emb"][:S][None, :, :]
         + jnp.take(params["type_emb"], token_type_ids, axis=0))
    x = layernorm(x.reshape(M, H), params["emb_ln_g"], params["emb_ln_b"])   # [M,H] bf16

    # BERT extended attention mask built ONCE as [B,1,S]; the attention index_map maps
    # directly onto batch b (no per-head replication in HBM).
    mask_bias = ((1.0 - attention_mask.astype(jnp.float32)) * -10000.0
                 ).reshape(B, 1, S)

    for p in params["layers"]:
        # fused QKV projection: one (M,H) x (H,3H) matmul; 1/sqrt(Dh) folded into Q weights
        qkv = dense(x, p["qkv_w"], p["qkv_b"])                               # [M,3H] bf16

        # flash attention reads Q/K/V straight from the [B,S,3H] layout and writes a
        # lane-dense [B,S,H] context block: no head split/merge transposes in HBM.
        ctx = flash_attention(qkv.reshape(B, S, 3 * H), mask_bias, nH)       # [B,S,H]
        ctx = ctx.reshape(M, H)                                              # free reshape

        # attention output projection + bias + residual + LayerNorm (fused epilogue)
        x = dense_res_ln(ctx, p["o_w"], p["o_b"], x, p["ln1_g"], p["ln1_b"])

        # feed-forward: GELU fused into FF1; bias + residual + LayerNorm fused into FF2
        ff = dense(x, p["i_w"], p["i_b"], activation="gelu")
        x = dense_res_ln(ff, p["f_w"], p["f_b"], x, p["ln2_g"], p["ln2_b"])

    # cls_pooling_strat -> pooler_output = tanh(CLS @ W + b).  Tiny (B,H)x(H,H) matmul
    # is left to XLA (sub-sublane row count; a kernel launch would be pure overhead).
    cls = x.reshape(B, S, H)[:, 0, :].astype(jnp.float32)
    pooled = jnp.tanh(cls @ params["pool_w"].astype(jnp.float32) + params["pool_b"])

    # self.drop(pooled): dropout is identity in eval mode
    # TODO(synk): training-mode dropout (rate=0.2) not applied; would use pltpu PRNG mask.
    return pooled


# -------------------------------------- main --------------------------------------

if __name__ == "__main__":
    cfg = dict(hidden=32, heads=2, intermediate=64, vocab=64, max_pos=16, layers=2)
    B, S = 2, 8

    key = jax.random.PRNGKey(0)
    pkey, ikey = jax.random.split(key)
    params = init_params(pkey, cfg)

    input_ids = jax.random.randint(ikey, (B, S), 0, cfg["vocab"], dtype=jnp.int32)
    token_type_ids = jnp.zeros((B, S), dtype=jnp.int32)
    attention_mask = jnp.array([[1] * S, [1] * (S - 2) + [0] * 2], dtype=jnp.int32)

    fwd = jax.jit(functools.partial(code_sim_sbert_forward, cfg=cfg))
    pooled = fwd(params, input_ids, token_type_ids, attention_mask)
    pooled = jax.block_until_ready(pooled)

    # predict()-style cosine similarity between the two pooled embeddings (plain-JAX glue)
    a, b = pooled[0], pooled[1]
    sim = jnp.dot(a, b) / (jnp.linalg.norm(a) * jnp.linalg.norm(b))
    sim = (sim + 1.0) / 2.0
    jax.block_until_ready(sim)

    assert pooled.shape == (B, cfg["hidden"])
    assert bool(jnp.all(jnp.isfinite(pooled)))
    print("KERNEL_OK")
</pallas_src>

<mosaic_0001>
module attributes {stable_mosaic.version = 11 : i64} {
  func.func @_ln_kernel(%arg0: i32, %arg1: memref<16x32xbf16, #tpu.memory_space<vmem>>, %arg2: memref<1x32xf32, #tpu.memory_space<vmem>>, %arg3: memref<1x32xf32, #tpu.memory_space<vmem>>, %arg4: memref<16x32xbf16, #tpu.memory_space<vmem>>) attributes {dimension_semantics = [#tpu.dimension_semantics<parallel>], iteration_bounds = array<i64: 1>, scalar_prefetch = 0 : i64, scratch_operands = 0 : i64, tpu.core_type = #tpu.core_type<tc>, window_params = [{transform_indices = @transform_0, window_bounds = array<i64: 16, 32>}, {pipeline_mode = #tpu.pipeline_mode<synchronous>, transform_indices = @transform_1, window_bounds = array<i64: 1, 32>}, {pipeline_mode = #tpu.pipeline_mode<synchronous>, transform_indices = @transform_2, window_bounds = array<i64: 1, 32>}, {transform_indices = @transform_3, window_bounds = array<i64: 16, 32>}]} {
    %c0 = arith.constant 0 : index
    %c0_0 = arith.constant 0 : index
    %0 = vector.load %arg1[%c0, %c0_0] : memref<16x32xbf16, #tpu.memory_space<vmem>>, vector<16x32xbf16>
    %1 = arith.extf %0 : vector<16x32xbf16> to vector<16x32xf32>
    %cst = arith.constant dense<0.000000e+00> : vector<16xf32>
    %2 = vector.multi_reduction <add>, %1, %cst [1] : vector<16x32xf32> to vector<16xf32>
    %3 = vector.shape_cast %2 : vector<16xf32> to vector<16x1xf32>
    %cst_1 = arith.constant 3.200000e+01 : f32
    %4 = vector.broadcast %cst_1 : f32 to vector<16x1xf32>
    %5 = arith.divf %3, %4 : vector<16x1xf32>
    %6 = vector.broadcast %5 : vector<16x1xf32> to vector<16x32xf32>
    %7 = arith.subf %1, %6 : vector<16x32xf32>
    %8 = arith.mulf %7, %7 : vector<16x32xf32>
    %cst_2 = arith.constant dense<0.000000e+00> : vector<16xf32>
    %9 = vector.multi_reduction <add>, %8, %cst_2 [1] : vector<16x32xf32> to vector<16xf32>
    %10 = vector.shape_cast %9 : vector<16xf32> to vector<16x1xf32>
    %cst_3 = arith.constant 3.200000e+01 : f32
    %11 = vector.broadcast %cst_3 : f32 to vector<16x1xf32>
    %12 = arith.divf %10, %11 : vector<16x1xf32>
    %13 = vector.broadcast %5 : vector<16x1xf32> to vector<16x32xf32>
    %14 = arith.subf %1, %13 : vector<16x32xf32>
    %cst_4 = arith.constant 9.99999996E-13 : f32
    %15 = vector.broadcast %cst_4 : f32 to vector<16x1xf32>
    %16 = arith.addf %12, %15 : vector<16x1xf32>
    %17 = math.rsqrt %16 : vector<16x1xf32>
    %18 = vector.broadcast %17 : vector<16x1xf32> to vector<16x32xf32>
    %19 = arith.mulf %14, %18 : vector<16x32xf32>
    %c0_5 = arith.constant 0 : index
    %c0_6 = arith.constant 0 : index
    %20 = vector.load %arg2[%c0_5, %c0_6] : memref<1x32xf32, #tpu.memory_space<vmem>>, vector<1x32xf32>
    %21 = vector.broadcast %20 : vector<1x32xf32> to vector<16x32xf32>
    %22 = arith.mulf %19, %21 : vector<16x32xf32>
    %c0_7 = arith.constant 0 : index
    %c0_8 = arith.constant 0 : index
    %23 = vector.load %arg3[%c0_7, %c0_8] : memref<1x32xf32, #tpu.memory_space<vmem>>, vector<1x32xf32>
    %24 = vector.broadcast %23 : vector<1x32xf32> to vector<16x32xf32>
    %25 = arith.addf %22, %24 : vector<16x32xf32>
    %26 = arith.truncf %25 : vector<16x32xf32> to vector<16x32xbf16>
    %c0_9 = arith.constant 0 : index
    %c0_10 = arith.constant 0 : index
    %27 = vector.load %arg4[%c0_9, %c0_10] : memref<16x32xbf16, #tpu.memory_space<vmem>>, vector<16x32xbf16>
    tpu.vector_store %arg4[%c0_9, %c0_10], %26 {strides = array<i32>} : memref<16x32xbf16, #tpu.memory_space<vmem>>, vector<16x32xbf16>,
    return
  }
  func.func @transform_0(%arg0: i32) -> (i32, i32) {
    %c0_i32 = arith.constant 0 : i32
    %c0_i32_0 = arith.constant 0 : i32
    return %arg0, %c0_i32 : i32, i32
  }
  func.func @transform_1(%arg0: i32) -> (i32, i32) {
    %c0_i32 = arith.constant 0 : i32
    %c0_i32_0 = arith.constant 0 : i32
    %c0_i32_1 = arith.constant 0 : i32
    return %c0_i32, %c0_i32_0 : i32, i32
  }
  func.func @transform_2(%arg0: i32) -> (i32, i32) {
    %c0_i32 = arith.constant 0 : i32
    %c0_i32_0 = arith.constant 0 : i32
    %c0_i32_1 = arith.constant 0 : i32
    return %c0_i32, %c0_i32_0 : i32, i32
  }
  func.func @transform_3(%arg0: i32) -> (i32, i32) {
    %c0_i32 = arith.constant 0 : i32
    %c0_i32_0 = arith.constant 0 : i32
    return %arg0, %c0_i32 : i32, i32
  }
}

module attributes {stable_mosaic.version = 11 : i64} {
  func.func @_dense_kernel(%arg0: i32, %arg1: i32, %arg2: i32, %arg3: memref<16x32xbf16, #tpu.memory_space<vmem>>, %arg4: memref<32x96xbf16, #tpu.memory_space<vmem>>, %arg5: memref<1x96xf32, #tpu.memory_space<vmem>>, %arg6: memref<16x96xbf16, #tpu.memory_space<vmem>>) attributes {dimension_semantics = [#tpu.dimension_semantics<parallel>, #tpu.dimension_semantics<parallel>, #tpu.dimension_semantics<arbitrary>], iteration_bounds = array<i64: 1, 1, 1>, scalar_prefetch = 0 : i64, scratch_operands = 0 : i64, tpu.core_type = #tpu.core_type<tc>, window_params = [{transform_indices = @transform_0, window_bounds = array<i64: 16, 32>}, {transform_indices = @transform_1, window_bounds = array<i64: 32, 96>}, {transform_indices = @transform_2, window_bounds = array<i64: 1, 96>}, {transform_indices = @transform_3, window_bounds = array<i64: 16, 96>}]} {
    %c0 = arith.constant 0 : index
    %c0_0 = arith.constant 0 : index
    %0 = vector.load %arg3[%c0, %c0_0] : memref<16x32xbf16, #tpu.memory_space<vmem>>, vector<16x32xbf16>
    %c0_1 = arith.constant 0 : index
    %c0_2 = arith.constant 0 : index
    %1 = vector.load %arg4[%c0_1, %c0_2] : memref<32x96xbf16, #tpu.memory_space<vmem>>, vector<32x96xbf16>
    %cst = arith.constant dense<0.000000e+00> : vector<16x96xf32>
    %2 = tpu.matmul %0, %1, %cst {dimension_numbers = #tpu.dot_dimension_numbers<[1], [0], [0], [1], [0, 0, 1, 1], [], []>} : vector<16x32xbf16>, vector<32x96xbf16>, vector<16x96xf32> -> vector<16x96xf32>
    %c0_3 = arith.constant 0 : index
    %c0_4 = arith.constant 0 : index
    %3 = vector.load %arg5[%c0_3, %c0_4] : memref<1x96xf32, #tpu.memory_space<vmem>>, vector<1x96xf32>
    %4 = vector.broadcast %3 : vector<1x96xf32> to vector<16x96xf32>
    %5 = arith.addf %2, %4 : vector<16x96xf32>
    %6 = arith.truncf %5 : vector<16x96xf32> to vector<16x96xbf16>
    %c0_5 = arith.constant 0 : index
    %c0_6 = arith.constant 0 : index
    %7 = vector.load %arg6[%c0_5, %c0_6] : memref<16x96xbf16, #tpu.memory_space<vmem>>, vector<16x96xbf16>
    tpu.vector_store %arg6[%c0_5, %c0_6], %6 {strides = array<i32>} : memref<16x96xbf16, #tpu.memory_space<vmem>>, vector<16x96xbf16>,
    return
  }
  func.func @transform_0(%arg0: i32, %arg1: i32, %arg2: i32) -> (i32, i32) {
    %c0_i32 = arith.constant 0 : i32
    return %arg0, %arg2 : i32, i32
  }
  func.func @transform_1(%arg0: i32, %arg1: i32, %arg2: i32) -> (i32, i32) {
    %c0_i32 = arith.constant 0 : i32
    return %arg2, %arg1 : i32, i32
  }
  func.func @transform_2(%arg0: i32, %arg1: i32, %arg2: i32) -> (i32, i32) {
    %c0_i32 = arith.constant 0 : i32
    %c0_i32_0 = arith.constant 0 : i32
    return %c0_i32, %arg1 : i32, i32
  }
  func.func @transform_3(%arg0: i32, %arg1: i32, %arg2: i32) -> (i32, i32) {
    %c0_i32 = arith.constant 0 : i32
    return %arg0, %arg1 : i32, i32
  }
}

module attributes {stable_mosaic.version = 11 : i64} {
  func.func @_dense_res_ln_kernel(%arg0: i32, %arg1: i32, %arg2: memref<16x32xbf16, #tpu.memory_space<vmem>>, %arg3: memref<32x32xbf16, #tpu.memory_space<vmem>>, %arg4: memref<1x32xf32, #tpu.memory_space<vmem>>, %arg5: memref<16x32xbf16, #tpu.memory_space<vmem>>, %arg6: memref<1x32xf32, #tpu.memory_space<vmem>>, %arg7: memref<1x32xf32, #tpu.memory_space<vmem>>, %arg8: memref<16x32xbf16, #tpu.memory_space<vmem>>) attributes {dimension_semantics = [#tpu.dimension_semantics<parallel>, #tpu.dimension_semantics<arbitrary>], iteration_bounds = array<i64: 1, 1>, scalar_prefetch = 0 : i64, scratch_operands = 0 : i64, tpu.core_type = #tpu.core_type<tc>, window_params = [{transform_indices = @transform_0, window_bounds = array<i64: 16, 32>}, {transform_indices = @transform_1, window_bounds = array<i64: 32, 32>}, {pipeline_mode = #tpu.pipeline_mode<synchronous>, transform_indices = @transform_2, window_bounds = array<i64: 1, 32>}, {transform_indices = @transform_3, window_bounds = array<i64: 16, 32>}, {pipeline_mode = #tpu.pipeline_mode<synchronous>, transform_indices = @transform_4, window_bounds = array<i64: 1, 32>}, {pipeline_mode = #tpu.pipeline_mode<synchronous>, transform_indices = @transform_5, window_bounds = array<i64: 1, 32>}, {transform_indices = @transform_6, window_bounds = array<i64: 16, 32>}]} {
    %c0 = arith.constant 0 : index
    %c0_0 = arith.constant 0 : index
    %0 = vector.load %arg2[%c0, %c0_0] : memref<16x32xbf16, #tpu.memory_space<vmem>>, vector<16x32xbf16>
    %c0_1 = arith.constant 0 : index
    %c0_2 = arith.constant 0 : index
    %1 = vector.load %arg3[%c0_1, %c0_2] : memref<32x32xbf16, #tpu.memory_space<vmem>>, vector<32x32xbf16>
    %cst = arith.constant dense<0.000000e+00> : vector<16x32xf32>
    %2 = tpu.matmul %0, %1, %cst {dimension_numbers = #tpu.dot_dimension_numbers<[1], [0], [0], [1], [0, 0, 1, 1], [], []>} : vector<16x32xbf16>, vector<32x32xbf16>, vector<16x32xf32> -> vector<16x32xf32>
    %c0_3 = arith.constant 0 : index
    %c0_4 = arith.constant 0 : index
    %3 = vector.load %arg4[%c0_3, %c0_4] : memref<1x32xf32, #tpu.memory_space<vmem>>, vector<1x32xf32>
    %4 = vector.broadcast %3 : vector<1x32xf32> to vector<16x32xf32>
    %5 = arith.addf %2, %4 : vector<16x32xf32>
    %c0_5 = arith.constant 0 : index
    %c0_6 = arith.constant 0 : index
    %6 = vector.load %arg5[%c0_5, %c0_6] : memref<16x32xbf16, #tpu.memory_space<vmem>>, vector<16x32xbf16>
    %7 = arith.extf %6 : vector<16x32xbf16> to vector<16x32xf32>
    %8 = arith.addf %5, %7 : vector<16x32xf32>
    %cst_7 = arith.constant dense<0.000000e+00> : vector<16xf32>
    %9 = vector.multi_reduction <add>, %8, %cst_7 [1] : vector<16x32xf32> to vector<16xf32>
    %10 = vector.shape_cast %9 : vector<16xf32> to vector<16x1xf32>
    %cst_8 = arith.constant 3.200000e+01 : f32
    %11 = vector.broadcast %cst_8 : f32 to vector<16x1xf32>
    %12 = arith.divf %10, %11 : vector<16x1xf32>
    %13 = vector.broadcast %12 : vector<16x1xf32> to vector<16x32xf32>
    %14 = arith.subf %8, %13 : vector<16x32xf32>
    %15 = arith.mulf %14, %14 : vector<16x32xf32>
    %cst_9 = arith.constant dense<0.000000e+00> : vector<16xf32>
    %16 = vector.multi_reduction <add>, %15, %cst_9 [1] : vector<16x32xf32> to vector<16xf32>
    %17 = vector.shape_cast %16 : vector<16xf32> to vector<16x1xf32>
    %cst_10 = arith.constant 3.200000e+01 : f32
    %18 = vector.broadcast %cst_10 : f32 to vector<16x1xf32>
    %19 = arith.divf %17, %18 : vector<16x1xf32>
    %20 = vector.broadcast %12 : vector<16x1xf32> to vector<16x32xf32>
    %21 = arith.subf %8, %20 : vector<16x32xf32>
    %cst_11 = arith.constant 9.99999996E-13 : f32
    %22 = vector.broadcast %cst_11 : f32 to vector<16x1xf32>
    %23 = arith.addf %19, %22 : vector<16x1xf32>
    %24 = math.rsqrt %23 : vector<16x1xf32>
    %25 = vector.broadcast %24 : vector<16x1xf32> to vector<16x32xf32>
    %26 = arith.mulf %21, %25 : vector<16x32xf32>
    %c0_12 = arith.constant 0 : index
    %c0_13 = arith.constant 0 : index
    %27 = vector.load %arg6[%c0_12, %c0_13] : memref<1x32xf32, #tpu.memory_space<vmem>>, vector<1x32xf32>
    %28 = vector.broadcast %27 : vector<1x32xf32> to vector<16x32xf32>
    %29 = arith.mulf %26, %28 : vector<16x32xf32>
    %c0_14 = arith.constant 0 : index
    %c0_15 = arith.constant 0 : index
    %30 = vector.load %arg7[%c0_14, %c0_15] : memref<1x32xf32, #tpu.memory_space<vmem>>, vector<1x32xf32>
    %31 = vector.broadcast %30 : vector<1x32xf32> to vector<16x32xf32>
    %32 = arith.addf %29, %31 : vector<16x32xf32>
    %33 = arith.truncf %32 : vector<16x32xf32> to vector<16x32xbf16>
    %c0_16 = arith.constant 0 : index
    %c0_17 = arith.constant 0 : index
    %34 = vector.load %arg8[%c0_16, %c0_17] : memref<16x32xbf16, #tpu.memory_space<vmem>>, vector<16x32xbf16>
    tpu.vector_store %arg8[%c0_16, %c0_17], %33 {strides = array<i32>} : memref<16x32xbf16, #tpu.memory_space<vmem>>, vector<16x32xbf16>,
    return
  }
  func.func @transform_0(%arg0: i32, %arg1: i32) -> (i32, i32) {
    %c0_i32 = arith.constant 0 : i32
    return %arg0, %arg1 : i32, i32
  }
  func.func @transform_1(%arg0: i32, %arg1: i32) -> (i32, i32) {
    %c0_i32 = arith.constant 0 : i32
    %c0_i32_0 = arith.constant 0 : i32
    return %arg1, %c0_i32 : i32, i32
  }
  func.func @transform_2(%arg0: i32, %arg1: i32) -> (i32, i32) {
    %c0_i32 = arith.constant 0 : i32
    %c0_i32_0 = arith.constant 0 : i32
    %c0_i32_1 = arith.constant 0 : i32
    return %c0_i32, %c0_i32_0 : i32, i32
  }
  func.func @transform_3(%arg0: i32, %arg1: i32) -> (i32, i32) {
    %c0_i32 = arith.constant 0 : i32
    %c0_i32_0 = arith.constant 0 : i32
    return %arg0, %c0_i32 : i32, i32
  }
  func.func @transform_4(%arg0: i32, %arg1: i32) -> (i32, i32) {
    %c0_i32 = arith.constant 0 : i32
    %c0_i32_0 = arith.constant 0 : i32
    %c0_i32_1 = arith.constant 0 : i32
    return %c0_i32, %c0_i32_0 : i32, i32
  }
  func.func @transform_5(%arg0: i32, %arg1: i32) -> (i32, i32) {
    %c0_i32 = arith.constant 0 : i32
    %c0_i32_0 = arith.constant 0 : i32
    %c0_i32_1 = arith.constant 0 : i32
    return %c0_i32, %c0_i32_0 : i32, i32
  }
  func.func @transform_6(%arg0: i32, %arg1: i32) -> (i32, i32) {
    %c0_i32 = arith.constant 0 : i32
    %c0_i32_0 = arith.constant 0 : i32
    return %arg0, %c0_i32 : i32, i32
  }
}

module attributes {stable_mosaic.version = 11 : i64} {
  func.func @_flash_attn_kernel_packed(%arg0: i32, %arg1: i32, %arg2: i32, %arg3: memref<1x8x96xbf16, #tpu.memory_space<vmem>>, %arg4: memref<1x8x96xbf16, #tpu.memory_space<vmem>>, %arg5: memref<1x1x8xf32, #tpu.memory_space<vmem>>, %arg6: memref<1x8x32xbf16, #tpu.memory_space<vmem>>, %arg7: memref<8x32xf32, #tpu.memory_space<vmem>>, %arg8: memref<8x32xf32, #tpu.memory_space<vmem>>, %arg9: memref<8x32xf32, #tpu.memory_space<vmem>>) attributes {dimension_semantics = [#tpu.dimension_semantics<parallel>, #tpu.dimension_semantics<parallel>, #tpu.dimension_semantics<arbitrary>], iteration_bounds = array<i64: 2, 1, 1>, scalar_prefetch = 0 : i64, scratch_operands = 3 : i64, tpu.core_type = #tpu.core_type<tc>, window_params = [{transform_indices = @transform_0, window_bounds = array<i64: 1, 8, 96>}, {transform_indices = @transform_1, window_bounds = array<i64: 1, 8, 96>}, {transform_indices = @transform_2, window_bounds = array<i64: 1, 1, 8>}, {transform_indices = @transform_3, window_bounds = array<i64: 1, 8, 32>}]} {
    %c0 = arith.constant 0 : index
    %c0_0 = arith.constant 0 : index
    %c0_1 = arith.constant 0 : index
    %0 = vector.load %arg3[%c0, %c0_0, %c0_1] : memref<1x8x96xbf16, #tpu.memory_space<vmem>>, vector<1x8x32xbf16>
    %1 = vector.shape_cast %0 : vector<1x8x32xbf16> to vector<8x32xbf16>
    %c0_2 = arith.constant 0 : index
    %c0_3 = arith.constant 0 : index
    %c32 = arith.constant 32 : index
    %2 = vector.load %arg4[%c0_2, %c0_3, %c32] : memref<1x8x96xbf16, #tpu.memory_space<vmem>>, vector<1x8x32xbf16>
    %3 = vector.shape_cast %2 : vector<1x8x32xbf16> to vector<8x32xbf16>
    %c0_4 = arith.constant 0 : index
    %c0_5 = arith.constant 0 : index
    %c64 = arith.constant 64 : index
    %4 = vector.load %arg4[%c0_4, %c0_5, %c64] : memref<1x8x96xbf16, #tpu.memory_space<vmem>>, vector<1x8x32xbf16>
    %5 = vector.shape_cast %4 : vector<1x8x32xbf16> to vector<8x32xbf16>
    %c0_i32 = arith.constant 0 : i32
    %6 = arith.cmpi eq, %arg2, %c0_i32 : i32
    %7 = arith.extui %6 : i1 to i32
    %c0_i32_6 = arith.constant 0 : i32
    %8 = arith.cmpi ne, %7, %c0_i32_6 : i32
    scf.if %8 {
      %cst_42 = arith.constant -1.000000e+30 : f32
      %80 = vector.broadcast %cst_42 : f32 to vector<8x32xf32>
      %c0_43 = arith.constant 0 : index
      %c0_44 = arith.constant 0 : index
      %81 = vector.load %arg7[%c0_43, %c0_44] : memref<8x32xf32, #tpu.memory_space<vmem>>, vector<8x32xf32>
      tpu.vector_store %arg7[%c0_43, %c0_44], %80 {strides = array<i32>} : memref<8x32xf32, #tpu.memory_space<vmem>>, vector<8x32xf32>,
      %cst_45 = arith.constant 0.000000e+00 : f32
      %82 = vector.broadcast %cst_45 : f32 to vector<8x32xf32>
      %c0_46 = arith.constant 0 : index
      %c0_47 = arith.constant 0 : index
      %83 = vector.load %arg8[%c0_46, %c0_47] : memref<8x32xf32, #tpu.memory_space<vmem>>, vector<8x32xf32>
      tpu.vector_store %arg8[%c0_46, %c0_47], %82 {strides = array<i32>} : memref<8x32xf32, #tpu.memory_space<vmem>>, vector<8x32xf32>,
      %cst_48 = arith.constant 0.000000e+00 : f32
      %84 = vector.broadcast %cst_48 : f32 to vector<8x32xf32>
      %c0_49 = arith.constant 0 : index
      %c0_50 = arith.constant 0 : index
      %85 = vector.load %arg9[%c0_49, %c0_50] : memref<8x32xf32, #tpu.memory_space<vmem>>, vector<8x32xf32>
      tpu.vector_store %arg9[%c0_49, %c0_50], %84 {strides = array<i32>} : memref<8x32xf32, #tpu.memory_space<vmem>>, vector<8x32xf32>,
    } else {
    }
    %c0_7 = arith.constant 0 : index
    %c0_8 = arith.constant 0 : index
    %c0_9 = arith.constant 0 : index
    %9 = vector.load %arg5[%c0_7, %c0_8, %c0_9] : memref<1x1x8xf32, #tpu.memory_space<vmem>>, vector<1x1x8xf32>
    %10 = vector.shape_cast %9 : vector<1x1x8xf32> to vector<1x8xf32>
    %11 = vector.extract_strided_slice %1 {offsets = [0, 0], sizes = [8, 16], strides = [1, 1]} : vector<8x32xbf16> to vector<8x16xbf16>
    %12 = vector.extract_strided_slice %3 {offsets = [0, 0], sizes = [8, 16], strides = [1, 1]} : vector<8x32xbf16> to vector<8x16xbf16>
    %13 = vector.extract_strided_slice %5 {offsets = [0, 0], sizes = [8, 16], strides = [1, 1]} : vector<8x32xbf16> to vector<8x16xbf16>
    %cst = arith.constant dense<0.000000e+00> : vector<8x8xf32>
    %14 = tpu.matmul %11, %12, %cst {dimension_numbers = #tpu.dot_dimension_numbers<[1], [1], [0], [0], [0, 0, 1, 0], [], []>} : vector<8x16xbf16>, vector<8x16xbf16>, vector<8x8xf32> -> vector<8x8xf32>
    %15 = vector.broadcast %10 : vector<1x8xf32> to vector<8x8xf32>
    %16 = arith.addf %14, %15 : vector<8x8xf32>
    %c0_10 = arith.constant 0 : index
    %c0_11 = arith.constant 0 : index
    %17 = vector.load %arg7[%c0_10, %c0_11] : memref<8x32xf32, #tpu.memory_space<vmem>>, vector<8x1xf32>
    %c0_12 = arith.constant 0 : index
    %c0_13 = arith.constant 0 : index
    %18 = vector.load %arg8[%c0_12, %c0_13] : memref<8x32xf32, #tpu.memory_space<vmem>>, vector<8x1xf32>
    %cst_14 = arith.constant dense<0xFF800000> : vector<8xf32>
    %19 = vector.multi_reduction <maximumf>, %16, %cst_14 [1] : vector<8x8xf32> to vector<8xf32>
    %20 = vector.shape_cast %19 : vector<8xf32> to vector<8x1xf32>
    %21 = arith.maximumf %17, %20 : vector<8x1xf32>
    %22 = arith.subf %17, %21 : vector<8x1xf32>
    %23 = math.exp %22 : vector<8x1xf32>
    %24 = vector.broadcast %21 : vector<8x1xf32> to vector<8x8xf32>
    %25 = arith.subf %16, %24 : vector<8x8xf32>
    %26 = math.exp %25 : vector<8x8xf32>
    %27 = arith.mulf %23, %18 : vector<8x1xf32>
    %cst_15 = arith.constant dense<0.000000e+00> : vector<8xf32>
    %28 = vector.multi_reduction <add>, %26, %cst_15 [1] : vector<8x8xf32> to vector<8xf32>
    %29 = vector.shape_cast %28 : vector<8xf32> to vector<8x1xf32>
    %30 = arith.addf %27, %29 : vector<8x1xf32>
    %31 = arith.truncf %26 : vector<8x8xf32> to vector<8x8xbf16>
    %cst_16 = arith.constant dense<0.000000e+00> : vector<8x16xf32>
    %32 = tpu.matmul %31, %13, %cst_16 {dimension_numbers = #tpu.dot_dimension_numbers<[1], [0], [0], [1], [0, 0, 1, 1], [], []>} : vector<8x8xbf16>, vector<8x16xbf16>, vector<8x16xf32> -> vector<8x16xf32>
    %c0_17 = arith.constant 0 : index
    %c0_18 = arith.constant 0 : index
    %33 = vector.load %arg9[%c0_17, %c0_18] : memref<8x32xf32, #tpu.memory_space<vmem>>, vector<8x16xf32>
    %34 = vector.broadcast %23 : vector<8x1xf32> to vector<8x16xf32>
    %35 = arith.mulf %34, %33 : vector<8x16xf32>
    %36 = arith.addf %35, %32 : vector<8x16xf32>
    %c0_19 = arith.constant 0 : index
    %c0_20 = arith.constant 0 : index
    %37 = vector.load %arg9[%c0_19, %c0_20] : memref<8x32xf32, #tpu.memory_space<vmem>>, vector<8x16xf32>
    tpu.vector_store %arg9[%c0_19, %c0_20], %36 {strides = array<i32>} : memref<8x32xf32, #tpu.memory_space<vmem>>, vector<8x16xf32>,
    %38 = vector.shape_cast %21 : vector<8x1xf32> to vector<8x1xf32>
    %39 = vector.broadcast %38 : vector<8x1xf32> to vector<8x16xf32>
    %c0_21 = arith.constant 0 : index
    %c0_22 = arith.constant 0 : index
    %40 = vector.load %arg7[%c0_21, %c0_22] : memref<8x32xf32, #tpu.memory_space<vmem>>, vector<8x16xf32>
    tpu.vector_store %arg7[%c0_21, %c0_22], %39 {strides = array<i32>} : memref<8x32xf32, #tpu.memory_space<vmem>>, vector<8x16xf32>,
    %41 = vector.shape_cast %30 : vector<8x1xf32> to vector<8x1xf32>
    %42 = vector.broadcast %41 : vector<8x1xf32> to vector<8x16xf32>
    %c0_23 = arith.constant 0 : index
    %c0_24 = arith.constant 0 : index
    %43 = vector.load %arg8[%c0_23, %c0_24] : memref<8x32xf32, #tpu.memory_space<vmem>>, vector<8x16xf32>
    tpu.vector_store %arg8[%c0_23, %c0_24], %42 {strides = array<i32>} : memref<8x32xf32, #tpu.memory_space<vmem>>, vector<8x16xf32>,
    %44 = vector.extract_strided_slice %1 {offsets = [0, 16], sizes = [8, 16], strides = [1, 1]} : vector<8x32xbf16> to vector<8x16xbf16>
    %45 = vector.extract_strided_slice %3 {offsets = [0, 16], sizes = [8, 16], strides = [1, 1]} : vector<8x32xbf16> to vector<8x16xbf16>
    %46 = vector.extract_strided_slice %5 {offsets = [0, 16], sizes = [8, 16], strides = [1, 1]} : vector<8x32xbf16> to vector<8x16xbf16>
    %cst_25 = arith.constant dense<0.000000e+00> : vector<8x8xf32>
    %47 = tpu.matmul %44, %45, %cst_25 {dimension_numbers = #tpu.dot_dimension_numbers<[1], [1], [0], [0], [0, 0, 1, 0], [], []>} : vector<8x16xbf16>, vector<8x16xbf16>, vector<8x8xf32> -> vector<8x8xf32>
    %48 = vector.broadcast %10 : vector<1x8xf32> to vector<8x8xf32>
    %49 = arith.addf %47, %48 : vector<8x8xf32>
    %c0_26 = arith.constant 0 : index
    %c16 = arith.constant 16 : index
    %50 = vector.load %arg7[%c0_26, %c16] : memref<8x32xf32, #tpu.memory_space<vmem>>, vector<8x1xf32>
    %c0_27 = arith.constant 0 : index
    %c16_28 = arith.constant 16 : index
    %51 = vector.load %arg8[%c0_27, %c16_28] : memref<8x32xf32, #tpu.memory_space<vmem>>, vector<8x1xf32>
    %cst_29 = arith.constant dense<0xFF800000> : vector<8xf32>
    %52 = vector.multi_reduction <maximumf>, %49, %cst_29 [1] : vector<8x8xf32> to vector<8xf32>
    %53 = vector.shape_cast %52 : vector<8xf32> to vector<8x1xf32>
    %54 = arith.maximumf %50, %53 : vector<8x1xf32>
    %55 = arith.subf %50, %54 : vector<8x1xf32>
    %56 = math.exp %55 : vector<8x1xf32>
    %57 = vector.broadcast %54 : vector<8x1xf32> to vector<8x8xf32>
    %58 = arith.subf %49, %57 : vector<8x8xf32>
    %59 = math.exp %58 : vector<8x8xf32>
    %60 = arith.mulf %56, %51 : vector<8x1xf32>
    %cst_30 = arith.constant dense<0.000000e+00> : vector<8xf32>
    %61 = vector.multi_reduction <add>, %59, %cst_30 [1] : vector<8x8xf32> to vector<8xf32>
    %62 = vector.shape_cast %61 : vector<8xf32> to vector<8x1xf32>
    %63 = arith.addf %60, %62 : vector<8x1xf32>
    %64 = arith.truncf %59 : vector<8x8xf32> to vector<8x8xbf16>
    %cst_31 = arith.constant dense<0.000000e+00> : vector<8x16xf32>
    %65 = tpu.matmul %64, %46, %cst_31 {dimension_numbers = #tpu.dot_dimension_numbers<[1], [0], [0], [1], [0, 0, 1, 1], [], []>} : vector<8x8xbf16>, vector<8x16xbf16>, vector<8x16xf32> -> vector<8x16xf32>
    %c0_32 = arith.constant 0 : index
    %c16_33 = arith.constant 16 : index
    %66 = vector.load %arg9[%c0_32, %c16_33] : memref<8x32xf32, #tpu.memory_space<vmem>>, vector<8x16xf32>
    %67 = vector.broadcast %56 : vector<8x1xf32> to vector<8x16xf32>
    %68 = arith.mulf %67, %66 : vector<8x16xf32>
    %69 = arith.addf %68, %65 : vector<8x16xf32>
    %c0_34 = arith.constant 0 : index
    %c16_35 = arith.constant 16 : index
    %70 = vector.load %arg9[%c0_34, %c16_35] : memref<8x32xf32, #tpu.memory_space<vmem>>, vector<8x16xf32>
    tpu.vector_store %arg9[%c0_34, %c16_35], %69 {strides = array<i32>} : memref<8x32xf32, #tpu.memory_space<vmem>>, vector<8x16xf32>,
    %71 = vector.shape_cast %54 : vector<8x1xf32> to vector<8x1xf32>
    %72 = vector.broadcast %71 : vector<8x1xf32> to vector<8x16xf32>
    %c0_36 = arith.constant 0 : index
    %c16_37 = arith.constant 16 : index
    %73 = vector.load %arg7[%c0_36, %c16_37] : memref<8x32xf32, #tpu.memory_space<vmem>>, vector<8x16xf32>
    tpu.vector_store %arg7[%c0_36, %c16_37], %72 {strides = array<i32>} : memref<8x32xf32, #tpu.memory_space<vmem>>, vector<8x16xf32>,
    %74 = vector.shape_cast %63 : vector<8x1xf32> to vector<8x1xf32>
    %75 = vector.broadcast %74 : vector<8x1xf32> to vector<8x16xf32>
    %c0_38 = arith.constant 0 : index
    %c16_39 = arith.constant 16 : index
    %76 = vector.load %arg8[%c0_38, %c16_39] : memref<8x32xf32, #tpu.memory_space<vmem>>, vector<8x16xf32>
    tpu.vector_store %arg8[%c0_38, %c16_39], %75 {strides = array<i32>} : memref<8x32xf32, #tpu.memory_space<vmem>>, vector<8x16xf32>,
    %c0_i32_40 = arith.constant 0 : i32
    %77 = arith.cmpi eq, %arg2, %c0_i32_40 : i32
    %78 = arith.extui %77 : i1 to i32
    %c0_i32_41 = arith.constant 0 : i32
    %79 = arith.cmpi ne, %78, %c0_i32_41 : i32
    scf.if %79 {
      %c0_42 = arith.constant 0 : index
      %c0_43 = arith.constant 0 : index
      %80 = vector.load %arg9[%c0_42, %c0_43] : memref<8x32xf32, #tpu.memory_space<vmem>>, vector<8x32xf32>
      %c0_44 = arith.constant 0 : index
      %c0_45 = arith.constant 0 : index
      %81 = vector.load %arg8[%c0_44, %c0_45] : memref<8x32xf32, #tpu.memory_space<vmem>>, vector<8x32xf32>
      %82 = arith.divf %80, %81 : vector<8x32xf32>
      %83 = arith.truncf %82 : vector<8x32xf32> to vector<8x32xbf16>
      %c0_46 = arith.constant 0 : index
      %c0_47 = arith.constant 0 : index
      %c0_48 = arith.constant 0 : index
      %84 = vector.load %arg6[%c0_46, %c0_47, %c0_48] : memref<1x8x32xbf16, #tpu.memory_space<vmem>>, vector<1x8x32xbf16>
      %85 = vector.shape_cast %84 : vector<1x8x32xbf16> to vector<8x32xbf16>
      %86 = vector.shape_cast %83 : vector<8x32xbf16> to vector<1x8x32xbf16>
      tpu.vector_store %arg6[%c0_46, %c0_47, %c0_48], %86 {strides = array<i32>} : memref<1x8x32xbf16, #tpu.memory_space<vmem>>, vector<1x8x32xbf16>,
    } else {
    }
    return
  }
  func.func @transform_0(%arg0: i32, %arg1: i32, %arg2: i32) -> (i32, i32, i32) {
    %c0_i32 = arith.constant 0 : i32
    %c0_i32_0 = arith.constant 0 : i32
    return %arg0, %arg1, %c0_i32 : i32, i32, i32
  }
  func.func @transform_1(%arg0: i32, %arg1: i32, %arg2: i32) -> (i32, i32, i32) {
    %c0_i32 = arith.constant 0 : i32
    %c0_i32_0 = arith.constant 0 : i32
    return %arg0, %arg2, %c0_i32 : i32, i32, i32
  }
  func.func @transform_2(%arg0: i32, %arg1: i32, %arg2: i32) -> (i32, i32, i32) {
    %c0_i32 = arith.constant 0 : i32
    %c0_i32_0 = arith.constant 0 : i32
    return %arg0, %c0_i32, %arg2 : i32, i32, i32
  }
  func.func @transform_3(%arg0: i32, %arg1: i32, %arg2: i32) -> (i32, i32, i32) {
    %c0_i32 = arith.constant 0 : i32
    %c0_i32_0 = arith.constant 0 : i32
    return %arg0, %arg1, %c0_i32 : i32, i32, i32
  }
}

module attributes {stable_mosaic.version = 11 : i64} {
  func.func @_dense_kernel(%arg0: i32, %arg1: i32, %arg2: i32, %arg3: memref<16x32xbf16, #tpu.memory_space<vmem>>, %arg4: memref<32x64xbf16, #tpu.memory_space<vmem>>, %arg5: memref<1x64xf32, #tpu.memory_space<vmem>>, %arg6: memref<16x64xbf16, #tpu.memory_space<vmem>>) attributes {dimension_semantics = [#tpu.dimension_semantics<parallel>, #tpu.dimension_semantics<parallel>, #tpu.dimension_semantics<arbitrary>], iteration_bounds = array<i64: 1, 1, 1>, scalar_prefetch = 0 : i64, scratch_operands = 0 : i64, tpu.core_type = #tpu.core_type<tc>, window_params = [{transform_indices = @transform_0, window_bounds = array<i64: 16, 32>}, {transform_indices = @transform_1, window_bounds = array<i64: 32, 64>}, {transform_indices = @transform_2, window_bounds = array<i64: 1, 64>}, {transform_indices = @transform_3, window_bounds = array<i64: 16, 64>}]} {
    %c0 = arith.constant 0 : index
    %c0_0 = arith.constant 0 : index
    %0 = vector.load %arg3[%c0, %c0_0] : memref<16x32xbf16, #tpu.memory_space<vmem>>, vector<16x32xbf16>
    %c0_1 = arith.constant 0 : index
    %c0_2 = arith.constant 0 : index
    %1 = vector.load %arg4[%c0_1, %c0_2] : memref<32x64xbf16, #tpu.memory_space<vmem>>, vector<32x64xbf16>
    %cst = arith.constant dense<0.000000e+00> : vector<16x64xf32>
    %2 = tpu.matmul %0, %1, %cst {dimension_numbers = #tpu.dot_dimension_numbers<[1], [0], [0], [1], [0, 0, 1, 1], [], []>} : vector<16x32xbf16>, vector<32x64xbf16>, vector<16x64xf32> -> vector<16x64xf32>
    %c0_3 = arith.constant 0 : index
    %c0_4 = arith.constant 0 : index
    %3 = vector.load %arg5[%c0_3, %c0_4] : memref<1x64xf32, #tpu.memory_space<vmem>>, vector<1x64xf32>
    %4 = vector.broadcast %3 : vector<1x64xf32> to vector<16x64xf32>
    %5 = arith.addf %2, %4 : vector<16x64xf32>
    %cst_5 = arith.constant 5.000000e-01 : f32
    %6 = vector.broadcast %cst_5 : f32 to vector<16x64xf32>
    %7 = arith.mulf %6, %5 : vector<16x64xf32>
    %cst_6 = arith.constant 4.471500e-02 : f32
    %8 = vector.broadcast %cst_6 : f32 to vector<16x64xf32>
    %9 = arith.mulf %8, %5 : vector<16x64xf32>
    %10 = arith.mulf %9, %5 : vector<16x64xf32>
    %11 = arith.mulf %10, %5 : vector<16x64xf32>
    %12 = arith.addf %5, %11 : vector<16x64xf32>
    %cst_7 = arith.constant 0.797884583 : f32
    %13 = vector.broadcast %cst_7 : f32 to vector<16x64xf32>
    %14 = arith.mulf %13, %12 : vector<16x64xf32>
    %15 = math.tanh %14 : vector<16x64xf32>
    %cst_8 = arith.constant 1.000000e+00 : f32
    %16 = vector.broadcast %cst_8 : f32 to vector<16x64xf32>
    %17 = arith.addf %16, %15 : vector<16x64xf32>
    %18 = arith.mulf %7, %17 : vector<16x64xf32>
    %19 = arith.truncf %18 : vector<16x64xf32> to vector<16x64xbf16>
    %c0_9 = arith.constant 0 : index
    %c0_10 = arith.constant 0 : index
    %20 = vector.load %arg6[%c0_9, %c0_10] : memref<16x64xbf16, #tpu.memory_space<vmem>>, vector<16x64xbf16>
    tpu.vector_store %arg6[%c0_9, %c0_10], %19 {strides = array<i32>} : memref<16x64xbf16, #tpu.memory_space<vmem>>, vector<16x64xbf16>,
    return
  }
  func.func @transform_0(%arg0: i32, %arg1: i32, %arg2: i32) -> (i32, i32) {
    %c0_i32 = arith.constant 0 : i32
    return %arg0, %arg2 : i32, i32
  }
  func.func @transform_1(%arg0: i32, %arg1: i32, %arg2: i32) -> (i32, i32) {
    %c0_i32 = arith.constant 0 : i32
    return %arg2, %arg1 : i32, i32
  }
  func.func @transform_2(%arg0: i32, %arg1: i32, %arg2: i32) -> (i32, i32) {
    %c0_i32 = arith.constant 0 : i32
    %c0_i32_0 = arith.constant 0 : i32
    return %c0_i32, %arg1 : i32, i32
  }
  func.func @transform_3(%arg0: i32, %arg1: i32, %arg2: i32) -> (i32, i32) {
    %c0_i32 = arith.constant 0 : i32
    return %arg0, %arg1 : i32, i32
  }
}

module attributes {stable_mosaic.version = 11 : i64} {
  func.func @_dense_res_ln_kernel(%arg0: i32, %arg1: i32, %arg2: memref<16x64xbf16, #tpu.memory_space<vmem>>, %arg3: memref<64x32xbf16, #tpu.memory_space<vmem>>, %arg4: memref<1x32xf32, #tpu.memory_space<vmem>>, %arg5: memref<16x32xbf16, #tpu.memory_space<vmem>>, %arg6: memref<1x32xf32, #tpu.memory_space<vmem>>, %arg7: memref<1x32xf32, #tpu.memory_space<vmem>>, %arg8: memref<16x32xbf16, #tpu.memory_space<vmem>>) attributes {dimension_semantics = [#tpu.dimension_semantics<parallel>, #tpu.dimension_semantics<arbitrary>], iteration_bounds = array<i64: 1, 1>, scalar_prefetch = 0 : i64, scratch_operands = 0 : i64, tpu.core_type = #tpu.core_type<tc>, window_params = [{transform_indices = @transform_0, window_bounds = array<i64: 16, 64>}, {transform_indices = @transform_1, window_bounds = array<i64: 64, 32>}, {pipeline_mode = #tpu.pipeline_mode<synchronous>, transform_indices = @transform_2, window_bounds = array<i64: 1, 32>}, {transform_indices = @transform_3, window_bounds = array<i64: 16, 32>}, {pipeline_mode = #tpu.pipeline_mode<synchronous>, transform_indices = @transform_4, window_bounds = array<i64: 1, 32>}, {pipeline_mode = #tpu.pipeline_mode<synchronous>, transform_indices = @transform_5, window_bounds = array<i64: 1, 32>}, {transform_indices = @transform_6, window_bounds = array<i64: 16, 32>}]} {
    %c0 = arith.constant 0 : index
    %c0_0 = arith.constant 0 : index
    %0 = vector.load %arg2[%c0, %c0_0] : memref<16x64xbf16, #tpu.memory_space<vmem>>, vector<16x64xbf16>
    %c0_1 = arith.constant 0 : index
    %c0_2 = arith.constant 0 : index
    %1 = vector.load %arg3[%c0_1, %c0_2] : memref<64x32xbf16, #tpu.memory_space<vmem>>, vector<64x32xbf16>
    %cst = arith.constant dense<0.000000e+00> : vector<16x32xf32>
    %2 = tpu.matmul %0, %1, %cst {dimension_numbers = #tpu.dot_dimension_numbers<[1], [0], [0], [1], [0, 0, 1, 1], [], []>} : vector<16x64xbf16>, vector<64x32xbf16>, vector<16x32xf32> -> vector<16x32xf32>
    %c0_3 = arith.constant 0 : index
    %c0_4 = arith.constant 0 : index
    %3 = vector.load %arg4[%c0_3, %c0_4] : memref<1x32xf32, #tpu.memory_space<vmem>>, vector<1x32xf32>
    %4 = vector.broadcast %3 : vector<1x32xf32> to vector<16x32xf32>
    %5 = arith.addf %2, %4 : vector<16x32xf32>
    %c0_5 = arith.constant 0 : index
    %c0_6 = arith.constant 0 : index
    %6 = vector.load %arg5[%c0_5, %c0_6] : memref<16x32xbf16, #tpu.memory_space<vmem>>, vector<16x32xbf16>
    %7 = arith.extf %6 : vector<16x32xbf16> to vector<16x32xf32>
    %8 = arith.addf %5, %7 : vector<16x32xf32>
    %cst_7 = arith.constant dense<0.000000e+00> : vector<16xf32>
    %9 = vector.multi_reduction <add>, %8, %cst_7 [1] : vector<16x32xf32> to vector<16xf32>
    %10 = vector.shape_cast %9 : vector<16xf32> to vector<16x1xf32>
    %cst_8 = arith.constant 3.200000e+01 : f32
    %11 = vector.broadcast %cst_8 : f32 to vector<16x1xf32>
    %12 = arith.divf %10, %11 : vector<16x1xf32>
    %13 = vector.broadcast %12 : vector<16x1xf32> to vector<16x32xf32>
    %14 = arith.subf %8, %13 : vector<16x32xf32>
    %15 = arith.mulf %14, %14 : vector<16x32xf32>
    %cst_9 = arith.constant dense<0.000000e+00> : vector<16xf32>
    %16 = vector.multi_reduction <add>, %15, %cst_9 [1] : vector<16x32xf32> to vector<16xf32>
    %17 = vector.shape_cast %16 : vector<16xf32> to vector<16x1xf32>
    %cst_10 = arith.constant 3.200000e+01 : f32
    %18 = vector.broadcast %cst_10 : f32 to vector<16x1xf32>
    %19 = arith.divf %17, %18 : vector<16x1xf32>
    %20 = vector.broadcast %12 : vector<16x1xf32> to vector<16x32xf32>
    %21 = arith.subf %8, %20 : vector<16x32xf32>
    %cst_11 = arith.constant 9.99999996E-13 : f32
    %22 = vector.broadcast %cst_11 : f32 to vector<16x1xf32>
    %23 = arith.addf %19, %22 : vector<16x1xf32>
    %24 = math.rsqrt %23 : vector<16x1xf32>
    %25 = vector.broadcast %24 : vector<16x1xf32> to vector<16x32xf32>
    %26 = arith.mulf %21, %25 : vector<16x32xf32>
    %c0_12 = arith.constant 0 : index
    %c0_13 = arith.constant 0 : index
    %27 = vector.load %arg6[%c0_12, %c0_13] : memref<1x32xf32, #tpu.memory_space<vmem>>, vector<1x32xf32>
    %28 = vector.broadcast %27 : vector<1x32xf32> to vector<16x32xf32>
    %29 = arith.mulf %26, %28 : vector<16x32xf32>
    %c0_14 = arith.constant 0 : index
    %c0_15 = arith.constant 0 : index
    %30 = vector.load %arg7[%c0_14, %c0_15] : memref<1x32xf32, #tpu.memory_space<vmem>>, vector<1x32xf32>
    %31 = vector.broadcast %30 : vector<1x32xf32> to vector<16x32xf32>
    %32 = arith.addf %29, %31 : vector<16x32xf32>
    %33 = arith.truncf %32 : vector<16x32xf32> to vector<16x32xbf16>
    %c0_16 = arith.constant 0 : index
    %c0_17 = arith.constant 0 : index
    %34 = vector.load %arg8[%c0_16, %c0_17] : memref<16x32xbf16, #tpu.memory_space<vmem>>, vector<16x32xbf16>
    tpu.vector_store %arg8[%c0_16, %c0_17], %33 {strides = array<i32>} : memref<16x32xbf16, #tpu.memory_space<vmem>>, vector<16x32xbf16>,
    return
  }
  func.func @transform_0(%arg0: i32, %arg1: i32) -> (i32, i32) {
    %c0_i32 = arith.constant 0 : i32
    return %arg0, %arg1 : i32, i32
  }
  func.func @transform_1(%arg0: i32, %arg1: i32) -> (i32, i32) {
    %c0_i32 = arith.constant 0 : i32
    %c0_i32_0 = arith.constant 0 : i32
    return %arg1, %c0_i32 : i32, i32
  }
  func.func @transform_2(%arg0: i32, %arg1: i32) -> (i32, i32) {
    %c0_i32 = arith.constant 0 : i32
    %c0_i32_0 = arith.constant 0 : i32
    %c0_i32_1 = arith.constant 0 : i32
    return %c0_i32, %c0_i32_0 : i32, i32
  }
  func.func @transform_3(%arg0: i32, %arg1: i32) -> (i32, i32) {
    %c0_i32 = arith.constant 0 : i32
    %c0_i32_0 = arith.constant 0 : i32
    return %arg0, %c0_i32 : i32, i32
  }
  func.func @transform_4(%arg0: i32, %arg1: i32) -> (i32, i32) {
    %c0_i32 = arith.constant 0 : i32
    %c0_i32_0 = arith.constant 0 : i32
    %c0_i32_1 = arith.constant 0 : i32
    return %c0_i32, %c0_i32_0 : i32, i32
  }
  func.func @transform_5(%arg0: i32, %arg1: i32) -> (i32, i32) {
    %c0_i32 = arith.constant 0 : i32
    %c0_i32_0 = arith.constant 0 : i32
    %c0_i32_1 = arith.constant 0 : i32
    return %c0_i32, %c0_i32_0 : i32, i32
  }
  func.func @transform_6(%arg0: i32, %arg1: i32) -> (i32, i32) {
    %c0_i32 = arith.constant 0 : i32
    %c0_i32_0 = arith.constant 0 : i32
    return %arg0, %c0_i32 : i32, i32
  }
}

</mosaic_0001>

<bundles_post_ra>
// kernel: code_sim_sbert_forward.14
= control target key start
LH: loop header
LB: loop body
LE: loop exit
PB: predicated region body
PF: predicated region fallthrough
CT: control target
= control target key end

     0   :  { %v200_v0 = vmov 0.0   ;;  %vm201_vm0 = vmmov 0   ;;  %vm54_vm1 = vcmask 261120   ;;  %vm158_vm2 = vcmask 257024   ;;  %s269_s1 = inlined_call_operand.vmem [shape: bf16[32,32], index: 1, kind: input, shape index: {}]   ;;  %s270_s0 = inlined_call_operand.vmem [shape: bf16[16,32], index: 0, kind: input, shape index: {}]   ;;  %s271_s3 = inlined_call_operand.vmem [shape: bf16[16,32], index: 3, kind: input, shape index: {}]   ;;  %s272_s2 = inlined_call_operand.vmem [shape: f32[1,32], index: 2, kind: input, shape index: {}]   ;;  %s273_s4 = inlined_call_operand.vmem [shape: f32[1,32], index: 4, kind: input, shape index: {}]   ;;  %s274_s5 = inlined_call_operand.vmem [shape: f32[1,32], index: 5, kind: input, shape index: {}]   ;;  %s275_s6 = inlined_call_operand.vmem [shape: bf16[16,32], index: 6, kind: output, shape index: {}]  }
   0x1   :  { %183 = vmatprep.subr.bf16.mxu0 %v200_v0  ;;  %v193_v1 = vld [vmem:[%s269_s1] sm:$0xff]   ;;  %187 = vmatprep.mubr.msk.bf16.mxu0 %vm201_vm0, %v200_v0  ;;  %v194_v2 = vld [vmem:[%s269_s1 + $0x8] sm:$0xff]  }
   0x2   :  { %184 = vmatpush3.bf16.msra.mxu0 %v193_v1  ;;  %v195_v3 = vld [vmem:[%s270_s0] sm:$0xff]  }
   0x3   :  { %185 = vmatprep.subr.bf16.mxu0 %v200_v0  ;;  %v177_v4 = vld [vmem:[%s271_s3] sm:$0xff]  }
   0x4   :  { %v165_v5 = vld [vmem:[%s272_s2] ss:$0 sm:$0xff]  ;;  %v178_v6 = vunpack.c.l.bf16 %v177_v4  ;;  %v179_v10 = vunpack.c.h.bf16 %v177_v4 }
   0x5   :  { %v170_v35 = vld [vmem:[%s273_s4] ss:$0 sm:$0xff] }
   0x6   :  { %186 = vmatpush3.bf16.msra.mxu0 %v194_v2  ;;  %v171_v37 = vld [vmem:[%s274_s5] ss:$0 sm:$0xff] }
   0x9   :  { %188 = vmatmul.mubr.msk.bf16.vlgmr.msra.gmra.mrb[0].mxu0 %vm54_vm1, %v195_v3 }
  0xdc   :  { %v92_v7 = vpop.f32.mrb[0].mxu0 }
  0xdd   :  { %v93_v8 = vadd.f32 %v165_v5, %v92_v7  ;;  %v189_v9 = vpop.f32.mrb[1].mxu0 }
  0xde   :  { %v95_v11 = vpop.f32.mrb[2].mxu0 }
  0xdf   :  { %v96_v12 = vadd.f32 %v165_v5, %v95_v11  ;;  %v190_v13 = vpop.f32.mrb[3].mxu0  ;;  %v103_v14 = vadd.f32 %v178_v6, %v93_v8 }
  0xe1   :  { %v105_v15 = vsel %vm54_vm1, %v103_v14, 0.0  ;;  %v104_v16 = vadd.f32 %v179_v10, %v96_v12 }
  0xe2   :  { %106 = vadd.xlane.f32.xlu0 %v105_v15 }
  0xe3   :  { %v108_v17 = vsel %vm54_vm1, %v104_v16, 0.0 }
  0xe6   :  { %109 = vadd.xlane.f32.xlu0 %v108_v17 }
 0x16f   :  { %v107_v18 = vpop.xlane.xlu0 %106 }
 0x170   :  { %v112_v19 = vmul.f32 0.03125, %v107_v18 }
 0x172   :  { %v114_v20 = vsub.f32 %v103_v14, %v112_v19 }
 0x173   :  { %v110_v21 = vpop.xlane.xlu0 %109 }
 0x174   :  { %v113_v22 = vmul.f32 0.03125, %v110_v21  ;;  %v116_v23 = vmul.f32 %v114_v20, %v114_v20 }
 0x176   :  { %v115_v24 = vsub.f32 %v104_v16, %v113_v22  ;;  %v118_v25 = vsel %vm54_vm1, %v116_v23, 0.0 }
 0x177   :  { %119 = vadd.xlane.f32.xlu1 %v118_v25 }
 0x178   :  { %v117_v26 = vmul.f32 %v115_v24, %v115_v24 }
 0x17a   :  { %v121_v27 = vsel %vm54_vm1, %v117_v26, 0.0 }
 0x17b   :  { %122 = vadd.xlane.f32.xlu1 %v121_v27 }
 0x204   :  { %v120_v28 = vpop.xlane.xlu1 %119 }
 0x205   :  { %v124_v29 = vmul.f32 0.03125, %v120_v28 }
 0x207   :  { %v126_v30 = vadd.f32 1e-12, %v124_v29 }
 0x208   :  { %v123_v31 = vpop.xlane.xlu1 %122 }
 0x209   :  { %196 = vrsqrt.f32 %v126_v30  ;;  %v125_v32 = vmul.f32 0.03125, %v123_v31 }
 0x20b   :  { %v127_v33 = vadd.f32 1e-12, %v125_v32 }
 0x20d   :  { %198 = vrsqrt.f32 %v127_v33 }
 0x213   :  { %v197_v34 = vpop.eup %196 }
 0x214   :  { %v130_v36 = vmul.f32 %v197_v34, %v114_v20 }
 0x216   :  { %v139_v38 = vmul.f32 %v170_v35, %v130_v36 }
 0x217   :  { %v199_v39 = vpop.eup %198 }
 0x218   :  { %v148_v40 = vadd.f32 %v171_v37, %v139_v38  ;;  %v131_v41 = vmul.f32 %v199_v39, %v115_v24 }
 0x21a   :  { %v174_v42 = vpack.c.bf16 %v148_v40, %v148_v40  ;;  %v140_v43 = vmul.f32 %v170_v35, %v131_v41 }
 0x21c   :  { %159 = vst.msk [vmem:[%s275_s6] sm:$0xf] %vm158_vm2, %v174_v42  ;;  %v149_v44 = vadd.f32 %v171_v37, %v140_v43 }
 0x21e   :  { %v175_v45 = vpack.c.bf16 %v149_v44, %v149_v44 }
 0x220   :  { %160 = vst.msk [vmem:[%s275_s6 + $0x4] sm:$0xf] %vm158_vm2, %v175_v45 }

// kernel: code_sim_sbert_forward.11
= control target key start
LH: loop header
LB: loop body
LE: loop exit
PB: predicated region body
PF: predicated region fallthrough
CT: control target
= control target key end

     0   :  { %vm18_vm0 = vcmask 261120   ;;  %vm72_vm1 = vcmask 257024   ;;  %s132_s0 = inlined_call_operand.vmem [shape: bf16[16,32], index: 0, kind: input, shape index: {}]   ;;  %s133_s1 = inlined_call_operand.vmem [shape: f32[1,32], index: 1, kind: input, shape index: {}]   ;;  %s134_s2 = inlined_call_operand.vmem [shape: f32[1,32], index: 2, kind: input, shape index: {}]   ;;  %s135_s3 = inlined_call_operand.vmem [shape: bf16[16,32], index: 3, kind: output, shape index: {}]  }
   0x1   :  { %v86_v0 = vld [vmem:[%s132_s0] sm:$0xff]  }
   0x2   :  { %v87_v1 = vunpack.c.l.bf16 %v86_v0  ;;  %v88_v2 = vunpack.c.h.bf16 %v86_v0  ;;  %v79_v22 = vld [vmem:[%s133_s1] ss:$0 sm:$0xff] }
   0x3   :  { %v80_v24 = vld [vmem:[%s134_s2] ss:$0 sm:$0xff] }
   0x4   :  { %v19_v3 = vsel %vm18_vm0, %v87_v1, 0.0  ;;  %v22_v4 = vsel %vm18_vm0, %v88_v2, 0.0 }
   0x5   :  { %20 = vadd.xlane.f32.xlu0 %v19_v3 }
   0x9   :  { %23 = vadd.xlane.f32.xlu0 %v22_v4 }
  0x92   :  { %v21_v5 = vpop.xlane.xlu0 %20 }
  0x93   :  { %v26_v6 = vmul.f32 0.03125, %v21_v5 }
  0x95   :  { %v28_v7 = vsub.f32 %v87_v1, %v26_v6 }
  0x96   :  { %v24_v8 = vpop.xlane.xlu0 %23 }
  0x97   :  { %v27_v9 = vmul.f32 0.03125, %v24_v8  ;;  %v30_v10 = vmul.f32 %v28_v7, %v28_v7 }
  0x99   :  { %v29_v11 = vsub.f32 %v88_v2, %v27_v9  ;;  %v32_v12 = vsel %vm18_vm0, %v30_v10, 0.0 }
  0x9a   :  { %33 = vadd.xlane.f32.xlu1 %v32_v12 }
  0x9b   :  { %v31_v13 = vmul.f32 %v29_v11, %v29_v11 }
  0x9d   :  { %v35_v14 = vsel %vm18_vm0, %v31_v13, 0.0 }
  0x9e   :  { %36 = vadd.xlane.f32.xlu1 %v35_v14 }
 0x127   :  { %v34_v15 = vpop.xlane.xlu1 %33 }
 0x128   :  { %v38_v16 = vmul.f32 0.03125, %v34_v15 }
 0x12a   :  { %v40_v17 = vadd.f32 1e-12, %v38_v16 }
 0x12b   :  { %v37_v18 = vpop.xlane.xlu1 %36 }
 0x12c   :  { %89 = vrsqrt.f32 %v40_v17  ;;  %v39_v19 = vmul.f32 0.03125, %v37_v18 }
 0x12e   :  { %v41_v20 = vadd.f32 1e-12, %v39_v19 }
 0x130   :  { %91 = vrsqrt.f32 %v41_v20 }
 0x136   :  { %v90_v21 = vpop.eup %89 }
 0x137   :  { %v44_v23 = vmul.f32 %v90_v21, %v28_v7 }
 0x139   :  { %v53_v25 = vmul.f32 %v79_v22, %v44_v23 }
 0x13a   :  { %v92_v26 = vpop.eup %91 }
 0x13b   :  { %v62_v27 = vadd.f32 %v80_v24, %v53_v25  ;;  %v45_v28 = vmul.f32 %v92_v26, %v29_v11 }
 0x13d   :  { %v83_v29 = vpack.c.bf16 %v62_v27, %v62_v27  ;;  %v54_v30 = vmul.f32 %v79_v22, %v45_v28 }
 0x13f   :  { %73 = vst.msk [vmem:[%s135_s3] sm:$0xf] %vm72_vm1, %v83_v29  ;;  %v63_v31 = vadd.f32 %v80_v24, %v54_v30 }
 0x141   :  { %v84_v32 = vpack.c.bf16 %v63_v31, %v63_v31 }
 0x143   :  { %74 = vst.msk [vmem:[%s135_s3 + $0x4] sm:$0xf] %vm72_vm1, %v84_v32 }

// kernel: code_sim_sbert_forward.12
= control target key start
LH: loop header
LB: loop body
LE: loop exit
PB: predicated region body
PF: predicated region fallthrough
CT: control target
= control target key end

     0   :  { %v130_v0 = vmov 0.0   ;;  %vm131_vm0 = vmmov 0   ;;  %vm45_vm1 = vcmask 261120   ;;  %vm98_vm2 = vcmask 781312   ;;  %s170_s1 = inlined_call_operand.vmem [shape: bf16[32,96], index: 1, kind: input, shape index: {}]   ;;  %s171_s0 = inlined_call_operand.vmem [shape: bf16[16,32], index: 0, kind: input, shape index: {}]   ;;  %s172_s2 = inlined_call_operand.vmem [shape: f32[1,96], index: 2, kind: input, shape index: {}]   ;;  %s173_s3 = inlined_call_operand.vmem [shape: bf16[16,96], index: 3, kind: output, shape index: {}]  }
   0x1   :  { %117 = vmatprep.subr.bf16.mxu0 %v130_v0  ;;  %v127_v1 = vld [vmem:[%s170_s1] sm:$0xff]   ;;  %121 = vmatprep.mubr.msk.bf16.mxu0 %vm131_vm0, %v130_v0  ;;  %v128_v2 = vld [vmem:[%s170_s1 + $0x8] sm:$0xff]  }
   0x2   :  { %118 = vmatpush3.bf16.msra.mxu0 %v127_v1  ;;  %v129_v3 = vld [vmem:[%s171_s0] sm:$0xff]  }
   0x3   :  { %119 = vmatprep.subr.bf16.mxu0 %v130_v0  ;;  %v105_v4 = vld [vmem:[%s172_s2] ss:$0 sm:$0xff] }
   0x6   :  { %120 = vmatpush3.bf16.msra.mxu0 %v128_v2 }
   0x9   :  { %122 = vmatmul.mubr.msk.bf16.vlgmr.msra.gmra.mrb[0].mxu0 %vm45_vm1, %v129_v3 }
  0xdc   :  { %v83_v5 = vpop.f32.mrb[0].mxu0 }
  0xdd   :  { %v84_v6 = vadd.f32 %v105_v4, %v83_v5  ;;  %v123_v7 = vpop.f32.mrb[1].mxu0 }
  0xde   :  { %v86_v8 = vpop.f32.mrb[2].mxu0 }
  0xdf   :  { %v112_v9 = vpack.c.bf16 %v84_v6, %v84_v6  ;;  %v87_v10 = vadd.f32 %v105_v4, %v86_v8  ;;  %v124_v11 = vpop.f32.mrb[3].mxu0 }
  0xe1   :  { %99 = vst.msk [vmem:[%s173_s3] sm:$0xf] %vm98_vm2, %v112_v9  ;;  %v113_v12 = vpack.c.bf16 %v87_v10, %v87_v10 }
  0xe3   :  { %100 = vst.msk [vmem:[%s173_s3 + $0x4] sm:$0xf] %vm98_vm2, %v113_v12 }

// kernel: code_sim_sbert_forward.13
= control target key start
LH: loop header
LB: loop body
LE: loop exit
PB: predicated region body
PF: predicated region fallthrough
CT: control target
= control target key end

     0   :  { %s830_s12 = smov 0   ;;  %s832_s13 = smov 0   ;;  %s914_s0 = inlined_call_operand.vmem [shape: bf16[2,8,96], index: 0, kind: input, shape index: {}, may-alias: {0,1}]   ;;  %s915_s1 = inlined_call_operand.vmem [shape: bf16[2,8,96], index: 1, kind: input, shape index: {}, may-alias: {0,1}]   ;;  %s916_s2 = inlined_call_operand.vmem [shape: f32[2,1,8], index: 2, kind: input, shape index: {}]   ;;  %s917_s3 = inlined_call_operand.vmem [shape: bf16[2,8,32], index: 3, kind: output, shape index: {}]  }
   0x1   :  { %s834_s14 = smov 0  }
   0x2 LB: > { %s32_s15 = sadd.s32 1, %s793_s13  ;;  %p679_p0 = scmp.ge.s32.totalorder %s797_s14, 1  ;;  %s797_s14 = sphi %s834_s14, %s13_s14   ;;  %s793_s13 = sphi %s832_s13, %s919_s13   ;;  %s789_s12 = sphi %s830_s12, %s918_s12  }
   0x3   : > { %p34_p1 = scmp.ge.s32.totalorder %s32_s15, 2  ;;  %p189_p2 = scmp.lt.s32.totalorder %s797_s14, 3 }
   0x5   : > { %s921_s15 = smov (%p34_p1, %s32_s15), 0  ;;  %p190_p3 = pnand %p679_p0, %p189_p2 }
   0x6   : > { %p230_p4 = scmp.lt.s32.totalorder (!%p190_p3), %s789_s12, 1  ;;  %v799_v0 = vmov (!%p190_p3), 0.0   ;;  %vm800_vm0 = vmmov (!%p190_p3), 0   ;;  %s801_s20 = smov (!%p190_p3), 96   ;;  %vm280_vm1 = vcmask (!%p190_p3), 130048   ;;  %vm264_vm2 = vcmask (!%p190_p3), 261120  }
   0x7   : > { %193 = sbr.rel (%p190_p3) target bundleno = 1499 (0x5db), region = 32  ;;  %700 = vmatprep.subr.bf16.mxu0 (!%p190_p3), %v799_v0  ;;  %702 = vmatprep.mubr.msk.bf16.mxu0 (!%p190_p3), %vm800_vm0, %v799_v0  ;;  %v802_v5 = vmov (!%p190_p3), -1e+30   ;;  %266 = vst.msk [vmem:[#allocation3] sm:$0xff] (!%p190_p3), %vm264_vm2, %v799_v0  ;;  %267 = vst.msk [vmem:[#allocation4] sm:$0xff] (!%p190_p3), %vm264_vm2, %v799_v0  ;;  %vm329_vm3 = vcmask (!%p190_p3), 64512  }
   0x8   : > { %706 = vmatprep.subr.bf16.mxu1 (!%p190_p3), %v799_v0  ;;  %708 = vmatprep.mubr.msk.bf16.mxu1 (!%p190_p3), %vm800_vm0, %v799_v0  ;;  %265 = vst.msk [vmem:[#allocation2] sm:$0xff] (!%p190_p3), %vm264_vm2, %v802_v5  ;;  %v803_v13 = vmov (!%p190_p3), 0   ;;  %s804_s27 = smov (!%p190_p3), 64   ;;  %s805_s28 = smov (!%p190_p3), 80   ;;  %vm356_vm4 = vcmask (!%p190_p3), 1043456   ;;  %v807_v38 = vmov (!%p190_p3), 16  }
   0x9   : > { %759 = vset.pattern.permute.xlu1 (!%p190_p3), %v803_v13  ;;  %s806_s29 = smov (!%p190_p3), 112   ;;  %760 = vset.pattern.permute.xlu0 (!%p190_p3), %v807_v38  ;;  %s808_s30 = smov (!%p190_p3), 48   ;;  %vm552_vm5 = vcmask (!%p190_p3), 261248   ;;  %vm569_vm6 = vcmask (!%p190_p3), 257024  }
   0xa   : > { %s809_s4 = smov (!%p190_p3), 16  }
   0xe   : > { %s923_s12 = smov (!%p230_p4, %s789_s12), 1  ;;  %v328_v51 = vld [vmem:[#allocation3] sm:$0xff]  ;;  %v400_v55 = vld [vmem:[#allocation4] sm:$0xff] }
   0xf   : > { %s854_s16 = sshll.u32 %s923_s12, 2  ;;  %s249_s26 = scalar_lea.vmem %s916_s2, %s923_s12  ;;  %v327_v14 = vld [vmem:[#allocation2] sm:$0xff] }
  0x10   : > { %s243_s19 = scalar_lea.vmem %s915_s1, %s854_s16  ;;  %s236_s23 = scalar_lea.vmem %s914_s0, %s854_s16  ;;  %v683_v6 = vld [vmem:[%s249_s26] ss:$0 sm:$0xff] }
  0x11   : > { %v860_v1 = vld [vmem:[%s243_s19] ss:$0 sps:$4 sm:$0xff]   ;;  %s256_s7 = scalar_lea.vmem %s917_s3, %s854_s16 }
  0x12   : > { %278 = vrot.lane.b32.xlu0 %v860_v1, %s801_s20  ;;  %v258_v4 = vld [vmem:[%s236_s23] sm:$0xf] }
  0x13   : > { %v687_v17 = vcombine.low %v258_v4, %v258_v4 }
  0x84   : > { %v279_v2 = vpop.permute.xlu0 %278 }
  0x85   : > { %v285_v3 = vsel %vm280_vm1, %v279_v2, 0 }
  0x86   : > { %701 = vmatpush3.bf16.xpose.msra.mxu0 %v285_v3 }
  0x87   : > { %718 = vmatprep.subr.bf16.mxu0 %v799_v0 }
  0x8d   : > { %703 = vmatmul.mubr.msk.bf16.vlgmr.msra.gmra.mrb[0].mxu0 %vm280_vm1, %v258_v4 }
  0x8e   : > { %720 = vmatprep.mubr.msk.bf16.mxu0 %vm800_vm0, %v799_v0 }
 0x160   : > { %v321_v7 = vpop.f32.mrb[0].mxu0 }
 0x161   : > { %v322_v8 = vadd.f32 %v683_v6, %v321_v7  ;;  %v704_v9 = vpop.f32.mrb[1].mxu0 }
 0x162   : > { %v324_v10 = vpop.f32.mrb[2].mxu0 }
 0x163   : > { %v705_v11 = vpop.f32.mrb[3].mxu0  ;;  %v330_v12 = vsel %vm329_vm3, %v322_v8, -inf }
 0x164   : > { %331 = vmax.xlane.f32.xlu0 %v330_v12 }
 0x1f1   : > { %v332_v15 = vpop.xlane.xlu0 %331 }
 0x1f2   : > { %v333_v16 = vmax.f32 %v327_v14, %v332_v15 }
 0x1f4   : > { %339 = vperm.xlu1 %759, %v333_v16   ;;  %v334_v39 = vsub.f32 %v327_v14, %v333_v16 }
 0x1f6   : > { %v335_v41 = vmul.f32 1.442695, %v334_v39 }
 0x1f8   : > { %351 = vrot.lane.b32.xlu1 %v860_v1, %s804_s27 }
 0x1fc   : > { %421 = vrot.lane.b32.xlu1 %v860_v1, %s805_s28 }
 0x200   : > { %419 = vrot.lane.b32.xlu1 %v687_v17, %s806_s29 }
 0x273   : > { %v340_v18 = vpop.permute.xlu1 %339 }
 0x274   : > { %v342_v19 = vsub.f32 %v322_v8, %v340_v18  ;;  %409 = vst.msk [vmem:[#allocation2] sm:$0xff] %vm280_vm1, %v340_v18 }
 0x276   : > { %v343_v20 = vmul.f32 1.442695, %v342_v19 }
 0x277   : > { %v352_v21 = vpop.permute.xlu1 %351 }
 0x278   : > { %765 = vpow2.f32 %v343_v20  ;;  %v358_v22 = vsel %vm356_vm4, %v352_v21, 0 }
 0x279   : > { %707 = vmatpush3.bf16.msra.mxu1 %v358_v22  ;;  %767 = vpow2.f32 %v335_v41 }
 0x27a   : > { %712 = vmatprep.subr.bf16.mxu1 %v799_v0 }
 0x27b   : > { %v422_v23 = vpop.permute.xlu1 %421  ;;  %v469_v43 = vld [vmem:[#allocation2] sm:$0xff] }
 0x27c   : > { %v427_v25 = vsel %vm280_vm1, %v422_v23, 0 }
 0x27f   : > { %v420_v27 = vpop.permute.xlu1 %419 }
 0x282   : > { %v766_v24 = vpop.eup %765 }
 0x283   : > { %v350_v26 = vpack.c.bf16 %v766_v24, %v766_v24  ;;  %v346_v40 = vsel %vm329_vm3, %v766_v24, 0.0  ;;  %v768_v42 = vpop.eup %767 }
 0x284   : > { %v345_v52 = vmul.f32 %v768_v42, %v328_v51 }
 0x285   : > { %709 = vmatmul.mubr.msk.bf16.vlgmr.msra.gmra.mrb[0].mxu1 %vm329_vm3, %v350_v26 }
 0x286   : > { %713 = vmatpush3.bf16.xpose.msra.mxu1 %v427_v25  ;;  %714 = vmatprep.mubr.msk.bf16.mxu1 %vm800_vm0, %v799_v0 }
 0x28d   : > { %715 = vmatmul.mubr.msk.bf16.vlgmr.msra.gmra.mrb[4].mxu1 %vm280_vm1, %v420_v27 }
 0x358   : > { %v394_v28 = vpop.f32.mrb[0].mxu1 }
 0x359   : > { %v710_v29 = vpop.f32.mrb[1].mxu1 }
 0x35a   : > { %v397_v30 = vpop.f32.mrb[2].mxu1 }
 0x35b   : > { %v711_v31 = vpop.f32.mrb[3].mxu1 }
 0x360   : > { %v463_v32 = vpop.f32.mrb[4].mxu1 }
 0x361   : > { %v464_v33 = vadd.f32 %v683_v6, %v463_v32  ;;  %v716_v34 = vpop.f32.mrb[5].mxu1 }
 0x362   : > { %v466_v35 = vpop.f32.mrb[6].mxu1 }
 0x363   : > { %v717_v36 = vpop.f32.mrb[7].mxu1  ;;  %v471_v37 = vsel %vm329_vm3, %v464_v33, -inf }
 0x364   : > { %472 = vmax.xlane.f32.xlu1 %v471_v37 }
 0x375   : > { %492 = vrot.lane.b32.xlu1 %v860_v1, %s808_s30 }
 0x399   : > { %347 = vadd.xlane.f32.xlu1 %v346_v40 }
 0x3aa   : > { %403 = vperm.xlu1 %759, %v768_v42  }
 0x3ae   : > { %763 = vset.pattern.permute.xlu1 %v807_v38 }
 0x3f1   : > { %v473_v44 = vpop.xlane.xlu1 %472 }
 0x3f2   : > { %v474_v45 = vmax.f32 %v469_v43, %v473_v44 }
 0x3f4   : > { %v475_v46 = vsub.f32 %v469_v43, %v474_v45  ;;  %480 = vperm.xlu0 %760, %v474_v45  }
 0x3f5   : > { %v493_v47 = vpop.permute.xlu1 %492 }
 0x3f6   : > { %v476_v48 = vmul.f32 1.442695, %v475_v46  ;;  %v498_v49 = vsel %vm356_vm4, %v493_v47, 0 }
 0x3f7   : > { %719 = vmatpush3.bf16.msra.mxu0 %v498_v49 }
 0x3f8   : > { %769 = vpow2.f32 %v476_v48  ;;  %761 = vset.pattern.permute.xlu0 %v803_v13 }
 0x402   : > { %v770_v50 = vpop.eup %769 }
 0x403   : > { %543 = vperm.xlu1 %763, %v770_v50  }
 0x426   : > { %v348_v53 = vpop.xlane.xlu1 %347 }
 0x427   : > { %v349_v54 = vadd.f32 %v348_v53, %v345_v52 }
 0x429   : > { %412 = vperm.xlu0 %761, %v349_v54  }
 0x42a   : > { %v404_v56 = vpop.permute.xlu1 %403 }
 0x42b   : > { %v406_v57 = vmul.f32 %v404_v56, %v400_v55 }
 0x42d   : > { %v407_v58 = vadd.f32 %v406_v57, %v394_v28  ;;  %762 = vset.pattern.permute.xlu0 %v807_v38 }
 0x42f   : > { %408 = vst.msk [vmem:[#allocation4] sm:$0xff] %vm280_vm1, %v407_v58 }
 0x436   : > { %v540_v13 = vld [vmem:[#allocation4] sm:$0xff] }
 0x473   : > { %v481_v59 = vpop.permute.xlu0 %480 }
 0x474   : > { %v483_v60 = vsub.f32 %v464_v33, %v481_v59  ;;  %554 = vst.msk [vmem:[#allocation2] sm:$0xff] %vm552_vm5, %v481_v59 }
 0x476   : > { %v484_v61 = vmul.f32 1.442695, %v483_v60 }
 0x478   : > { %771 = vpow2.f32 %v484_v61 }
 0x482   : > { %v772_v62 = vpop.eup %771  ;;  %v544_v11 = vpop.permute.xlu1 %543 }
 0x483   : > { %v487_v63 = vsel %vm329_vm3, %v772_v62, 0.0  ;;  %v491_v0 = vpack.c.bf16 %v772_v62, %v772_v62  ;;  %v546_v14 = vmul.f32 %v544_v11, %v540_v13 }
 0x484   : > { %488 = vadd.xlane.f32.xlu0 %v487_v63 }
 0x485   : > { %721 = vmatmul.mubr.msk.bf16.vlgmr.msra.gmra.mrb[4].mxu0 %vm329_vm3, %v491_v0 }
 0x4a8   : > { %v413_v1 = vpop.permute.xlu0 %412 }
 0x4a9   : > { %415 = vst.msk [vmem:[#allocation3] sm:$0xff] %vm280_vm1, %v413_v1 }
 0x4b0   : > { %v470_v2 = vld [vmem:[#allocation3] sm:$0xff] }
 0x4b1   : > { %v486_v3 = vmul.f32 %v770_v50, %v470_v2 }
 0x511   : > { %v489_v4 = vpop.xlane.xlu0 %488 }
 0x512   : > { %v490_v5 = vadd.f32 %v489_v4, %v486_v3 }
 0x514   : > { %557 = vperm.xlu0 %762, %v490_v5  }
 0x558   : > { %v534_v6 = vpop.f32.mrb[4].mxu0 }
 0x559   : > { %548 = vrot.lane.b32.xlu1 %v534_v6, %s809_s4  ;;  %v722_v7 = vpop.f32.mrb[5].mxu0 }
 0x55a   : > { %v537_v8 = vpop.f32.mrb[6].mxu0 }
 0x55b   : > { %v723_v9 = vpop.f32.mrb[7].mxu0 }
 0x593   : > { %v558_v10 = vpop.permute.xlu0 %557 }
 0x594   : > { %560 = vst.msk [vmem:[#allocation3] sm:$0xff] %vm552_vm5, %v558_v10 }
 0x59b   : > { %v565_v12 = vld [vmem:[#allocation3] sm:$0xff] }
 0x59c   : > { %773 = vrcp.f32 %v565_v12 }
 0x5a6   : > { %v774_v17 = vpop.eup %773 }
 0x5cb   : > { %v549_v15 = vpop.permute.xlu1 %548 }
 0x5cc   : > { %v551_v16 = vadd.f32 %v549_v15, %v546_v14 }
 0x5ce   : > { %553 = vst.msk [vmem:[#allocation4] sm:$0xff] %vm552_vm5, %v551_v16 }
 0x5d5   : > { %v564_v18 = vld [vmem:[#allocation4] sm:$0xff] }
 0x5d6   : > { %v567_v19 = vmul.f32 %v774_v17, %v564_v18 }
 0x5d8   : > { %v568_v20 = vpack.c.bf16 %v567_v19, %v567_v19 }
 0x5da   : > { %570 = vst.msk [vmem:[%s256_s7] sm:$0xf] %vm569_vm6, %v568_v20 }
 0x5db PF: > { %s13_s14 = sadd.s32 1, %s797_s14   ;;  %s918_s12 = smov %s793_s13 }
 0x5dc   : > { %p10_p5 = scmp.ge.s32.totalorder %s13_s14, 4   ;;  %s919_s13 = smov %s921_s15 }
 0x5de   :  { %12 = sbr.rel (!%p10_p5) target bundleno = 2 (0x2), region = 76 }

// kernel: code_sim_sbert_forward.15
= control target key start
LH: loop header
LB: loop body
LE: loop exit
PB: predicated region body
PF: predicated region fallthrough
CT: control target
= control target key end

     0   :  { %v152_v0 = vmov 0.0   ;;  %vm153_vm0 = vmmov 0   ;;  %vm45_vm1 = vcmask 261120   ;;  %vm116_vm2 = vcmask 519168   ;;  %s192_s1 = inlined_call_operand.vmem [shape: bf16[32,64], index: 1, kind: input, shape index: {}]   ;;  %s193_s0 = inlined_call_operand.vmem [shape: bf16[16,32], index: 0, kind: input, shape index: {}]   ;;  %s194_s2 = inlined_call_operand.vmem [shape: f32[1,64], index: 2, kind: input, shape index: {}]   ;;  %s195_s3 = inlined_call_operand.vmem [shape: bf16[16,64], index: 3, kind: output, shape index: {}]  }
   0x1   :  { %135 = vmatprep.subr.bf16.mxu0 %v152_v0  ;;  %v145_v1 = vld [vmem:[%s192_s1] sm:$0xff]   ;;  %139 = vmatprep.mubr.msk.bf16.mxu0 %vm153_vm0, %v152_v0  ;;  %v146_v2 = vld [vmem:[%s192_s1 + $0x8] sm:$0xff]  }
   0x2   :  { %136 = vmatpush3.bf16.msra.mxu0 %v145_v1  ;;  %v147_v3 = vld [vmem:[%s193_s0] sm:$0xff]  }
   0x3   :  { %137 = vmatprep.subr.bf16.mxu0 %v152_v0  ;;  %v123_v4 = vld [vmem:[%s194_s2] ss:$0 sm:$0xff] }
   0x6   :  { %138 = vmatpush3.bf16.msra.mxu0 %v146_v2 }
   0x9   :  { %140 = vmatmul.mubr.msk.bf16.vlgmr.msra.gmra.mrb[0].mxu0 %vm45_vm1, %v147_v3 }
  0xdc   :  { %v83_v5 = vpop.f32.mrb[0].mxu0 }
  0xdd   :  { %v84_v6 = vadd.f32 %v123_v4, %v83_v5  ;;  %v141_v7 = vpop.f32.mrb[1].mxu0 }
  0xde   :  { %v86_v8 = vpop.f32.mrb[2].mxu0 }
  0xdf   :  { %v92_v9 = vmul.f32 0.044715, %v84_v6  ;;  %v87_v10 = vadd.f32 %v123_v4, %v86_v8  ;;  %v142_v11 = vpop.f32.mrb[3].mxu0  ;;  %v90_v22 = vmul.f32 0.5, %v84_v6 }
  0xe1   :  { %v94_v12 = vmul.f32 %v92_v9, %v84_v6  ;;  %v93_v13 = vmul.f32 0.044715, %v87_v10  ;;  %v91_v26 = vmul.f32 0.5, %v87_v10 }
  0xe3   :  { %v96_v14 = vmul.f32 %v94_v12, %v84_v6  ;;  %v95_v15 = vmul.f32 %v93_v13, %v87_v10 }
  0xe5   :  { %v98_v16 = vadd.f32 %v96_v14, %v84_v6  ;;  %v97_v17 = vmul.f32 %v95_v15, %v87_v10 }
  0xe7   :  { %v100_v18 = vmul.f32 0.7978846, %v98_v16  ;;  %v99_v19 = vadd.f32 %v97_v17, %v87_v10 }
  0xe9   :  { %148 = vtanh.f32 %v100_v18  ;;  %v101_v20 = vmul.f32 0.7978846, %v99_v19 }
  0xeb   :  { %150 = vtanh.f32 %v101_v20 }
  0xf3   :  { %v149_v21 = vpop.eup %148 }
  0xf4   :  { %v104_v23 = vadd.f32 1.0, %v149_v21 }
  0xf5   :  { %v151_v24 = vpop.eup %150 }
  0xf6   :  { %v106_v25 = vmul.f32 %v104_v23, %v90_v22  ;;  %v105_v27 = vadd.f32 1.0, %v151_v24 }
  0xf8   :  { %v130_v28 = vpack.c.bf16 %v106_v25, %v106_v25  ;;  %v107_v29 = vmul.f32 %v105_v27, %v91_v26 }
  0xfa   :  { %117 = vst.msk [vmem:[%s195_s3] sm:$0xf] %vm116_vm2, %v130_v28  ;;  %v131_v30 = vpack.c.bf16 %v107_v29, %v107_v29 }
  0xfc   :  { %118 = vst.msk [vmem:[%s195_s3 + $0x4] sm:$0xf] %vm116_vm2, %v131_v30 }

// kernel: code_sim_sbert_forward.16
= control target key start
LH: loop header
LB: loop body
LE: loop exit
PB: predicated region body
PF: predicated region fallthrough
CT: control target
= control target key end

     0   :  { %v227_v0 = vmov 0.0   ;;  %vm228_vm0 = vmmov 0   ;;  %vm70_vm1 = vcmask 523264   ;;  %vm121_vm2 = vcmask 261120   ;;  %s301_s1 = inlined_call_operand.vmem [shape: bf16[64,32], index: 1, kind: input, shape index: {}]   ;;  %s302_s0 = inlined_call_operand.vmem [shape: bf16[16,64], index: 0, kind: input, shape index: {}]   ;;  %s303_s3 = inlined_call_operand.vmem [shape: bf16[16,32], index: 3, kind: input, shape index: {}]   ;;  %s304_s2 = inlined_call_operand.vmem [shape: f32[1,32], index: 2, kind: input, shape index: {}]   ;;  %s305_s4 = inlined_call_operand.vmem [shape: f32[1,32], index: 4, kind: input, shape index: {}]   ;;  %s306_s5 = inlined_call_operand.vmem [shape: f32[1,32], index: 5, kind: input, shape index: {}]   ;;  %s307_s6 = inlined_call_operand.vmem [shape: bf16[16,32], index: 6, kind: output, shape index: {}]  }
   0x1   :  { %204 = vmatprep.subr.bf16.mxu0 %v227_v0  ;;  %v218_v1 = vld [vmem:[%s301_s1] sm:$0xff]   ;;  %212 = vmatprep.mubr.msk.bf16.mxu0 %vm228_vm0, %v227_v0  ;;  %v219_v2 = vld [vmem:[%s301_s1 + $0x8] sm:$0xff]   ;;  %v220_v3 = vld [vmem:[%s301_s1 + $0x10] sm:$0xff]   ;;  %vm175_vm3 = vcmask 257024  }
   0x2   :  { %205 = vmatpush3.bf16.msra.mxu0 %v218_v1  ;;  %v221_v4 = vld [vmem:[%s301_s1 + $0x18] sm:$0xff]   ;;  %v222_v5 = vld [vmem:[%s302_s0] sm:$0xff]  }
   0x3   :  { %206 = vmatprep.subr.bf16.mxu0 %v227_v0  ;;  %v196_v6 = vld [vmem:[%s303_s3] sm:$0xff]  }
   0x4   :  { %v182_v7 = vld [vmem:[%s304_s2] ss:$0 sm:$0xff]  ;;  %v197_v8 = vunpack.c.l.bf16 %v196_v6  ;;  %v198_v12 = vunpack.c.h.bf16 %v196_v6 }
   0x5   :  { %v189_v37 = vld [vmem:[%s305_s4] ss:$0 sm:$0xff] }
   0x6   :  { %207 = vmatpush3.bf16.msra.mxu0 %v219_v2  ;;  %v190_v39 = vld [vmem:[%s306_s5] ss:$0 sm:$0xff] }
   0x7   :  { %208 = vmatprep.subr.bf16.mxu0 %v227_v0 }
   0xa   :  { %209 = vmatpush3.bf16.msra.mxu0 %v220_v3 }
   0xb   :  { %210 = vmatprep.subr.bf16.mxu0 %v227_v0 }
   0xe   :  { %211 = vmatpush3.bf16.msra.mxu0 %v221_v4 }
  0x11   :  { %213 = vmatmul.mubr.msk.bf16.vlgmr.msra.gmra.mrb[0].mxu0 %vm70_vm1, %v222_v5 }
  0xe4   :  { %v108_v9 = vpop.f32.mrb[0].mxu0 }
  0xe5   :  { %v109_v10 = vadd.f32 %v182_v7, %v108_v9  ;;  %v214_v11 = vpop.f32.mrb[1].mxu0 }
  0xe6   :  { %v111_v13 = vpop.f32.mrb[2].mxu0 }
  0xe7   :  { %v112_v14 = vadd.f32 %v182_v7, %v111_v13  ;;  %v215_v15 = vpop.f32.mrb[3].mxu0  ;;  %v119_v16 = vadd.f32 %v197_v8, %v109_v10 }
  0xe9   :  { %v122_v17 = vsel %vm121_vm2, %v119_v16, 0.0  ;;  %v120_v18 = vadd.f32 %v198_v12, %v112_v14 }
  0xea   :  { %123 = vadd.xlane.f32.xlu0 %v122_v17 }
  0xeb   :  { %v125_v19 = vsel %vm121_vm2, %v120_v18, 0.0 }
  0xee   :  { %126 = vadd.xlane.f32.xlu0 %v125_v19 }
 0x177   :  { %v124_v20 = vpop.xlane.xlu0 %123 }
 0x178   :  { %v129_v21 = vmul.f32 0.03125, %v124_v20 }
 0x17a   :  { %v131_v22 = vsub.f32 %v119_v16, %v129_v21 }
 0x17b   :  { %v127_v23 = vpop.xlane.xlu0 %126 }
 0x17c   :  { %v130_v24 = vmul.f32 0.03125, %v127_v23  ;;  %v133_v25 = vmul.f32 %v131_v22, %v131_v22 }
 0x17e   :  { %v132_v26 = vsub.f32 %v120_v18, %v130_v24  ;;  %v135_v27 = vsel %vm121_vm2, %v133_v25, 0.0 }
 0x17f   :  { %136 = vadd.xlane.f32.xlu1 %v135_v27 }
 0x180   :  { %v134_v28 = vmul.f32 %v132_v26, %v132_v26 }
 0x182   :  { %v138_v29 = vsel %vm121_vm2, %v134_v28, 0.0 }
 0x183   :  { %139 = vadd.xlane.f32.xlu1 %v138_v29 }
 0x20c   :  { %v137_v30 = vpop.xlane.xlu1 %136 }
 0x20d   :  { %v141_v31 = vmul.f32 0.03125, %v137_v30 }
 0x20f   :  { %v143_v32 = vadd.f32 1e-12, %v141_v31 }
 0x210   :  { %v140_v33 = vpop.xlane.xlu1 %139 }
 0x211   :  { %223 = vrsqrt.f32 %v143_v32  ;;  %v142_v34 = vmul.f32 0.03125, %v140_v33 }
 0x213   :  { %v144_v35 = vadd.f32 1e-12, %v142_v34 }
 0x215   :  { %225 = vrsqrt.f32 %v144_v35 }
 0x21b   :  { %v224_v36 = vpop.eup %223 }
 0x21c   :  { %v147_v38 = vmul.f32 %v224_v36, %v131_v22 }
 0x21e   :  { %v156_v40 = vmul.f32 %v189_v37, %v147_v38 }
 0x21f   :  { %v226_v41 = vpop.eup %225 }
 0x220   :  { %v165_v42 = vadd.f32 %v190_v39, %v156_v40  ;;  %v148_v43 = vmul.f32 %v226_v41, %v132_v26 }
 0x222   :  { %v193_v44 = vpack.c.bf16 %v165_v42, %v165_v42  ;;  %v157_v45 = vmul.f32 %v189_v37, %v148_v43 }
 0x224   :  { %176 = vst.msk [vmem:[%s307_s6] sm:$0xf] %vm175_vm3, %v193_v44  ;;  %v166_v46 = vadd.f32 %v190_v39, %v157_v45 }
 0x226   :  { %v194_v47 = vpack.c.bf16 %v166_v46, %v166_v46 }
 0x228   :  { %177 = vst.msk [vmem:[%s307_s6 + $0x4] sm:$0xf] %vm175_vm3, %v194_v47 }

</bundles_post_ra>
